<compile_context>
chip_gen: v5e
topology: v5e:2x2
jax: 0.10.0
libtpu: 0.0.40
codegen_flags: <defaults>
</compile_context>

<pallas_src>
import functools

import jax
import jax.numpy as jnp
import numpy as np
from jax.experimental import pallas as pl
from jax.experimental.pallas import tpu as pltpu

KH, KW, STRIDE = 3, 3, 2
LANES = 128        # TPU lane width
ROW_PAD = 16       # row (sublane) padding: 16 = bf16 packing granularity
K_PAD = 16         # patch-feature dim padded only to a multiple of 16 (dense)
M_BLK_CAP = 256    # per-frame row-block cap (VMEM-safe on v5e/v6e/v7x)


def _round_up(x, m):
    return (x + m - 1) // m * m


# --------------------------------------------------------------------------
# Fused forward kernel: conv+ReLU -> fc (both frames) -> MLP head (x frame).
# --------------------------------------------------------------------------
def _fused_forward_kernel(
    patches_ref,   # (P, M_BLK, KCP) bf16   dense patch features per position
    conv_w_ref,    # (KCP, NF)       bf16   conv weights (rows zero past K)
    conv_b_ref,    # (1, NF)         f32
    fc_w_ref,      # (P*NF, NP)      bf16   encoder fc (rows in (p, c) order)
    fc_b_ref,      # (1, NP)         f32
    act_ref,       # (M_BLK, AP)     bf16
    w1h_ref,       # (NP, HP)        bf16   mlp W1 rows for h
    w1a_ref,       # (AP, HP)        bf16   mlp W1 rows for action
    b1_ref,        # (1, HP)         f32
    w2_ref,        # (HP, HP)        bf16
    b2_ref,        # (1, HP)         f32
    w3_ref,        # (HP, NP)        bf16
    b3_ref,        # (1, NP)         f32
    pred_ref,      # (M_BLK, NP)     f32    MLP output (only x frame meaningful)
    hall_ref,      # (M_BLK, NP)     f32    encoder features
    cstage_ref,    # (M_BLK, P*NF)   bf16   VMEM scratch: relayouted conv acts
):
    P, M_BLK, KCP = patches_ref.shape
    NF = conv_w_ref.shape[1]

    # ---- Conv + bias + ReLU: ONE long-M matmul over all P output positions.
    # (P, M_BLK, KCP) -> (P*M_BLK, KCP) merges leading dims only (free).
    pat = patches_ref[...].reshape(P * M_BLK, KCP)
    c = jnp.dot(pat, conv_w_ref[...], preferred_element_type=jnp.float32)
    c = jnp.maximum(c + conv_b_ref[...], 0.0).astype(jnp.bfloat16)
    c = c.reshape(P, M_BLK, NF)

    # ---- Relayout (P, M_BLK, NF) -> (M_BLK, P*NF) via VMEM scratch:
    # 49 independent static stores (no loop-carried accumulator, no spills).
    for p in range(P):
        cstage_ref[:, p * NF:(p + 1) * NF] = c[p]

    # ---- Encoder fc: ONE long-K (P*NF) matmul.
    h_all = (jnp.dot(cstage_ref[...], fc_w_ref[...],
                     preferred_element_type=jnp.float32) + fc_b_ref[...])
    hall_ref[...] = h_all                      # full lane-dense (NP=128) store

    # ---- MLP head: Linear -> ReLU -> Linear -> ReLU -> Linear.
    # Only the x frame (grid axis 0 == 0) needs it; next_x blocks skip it.
    @pl.when(pl.program_id(0) == 0)
    def _():
        h = h_all.astype(jnp.bfloat16)
        # concat([h, action]) @ W1 == h @ W1_h + action @ W1_a
        z1 = (jnp.dot(h, w1h_ref[...], preferred_element_type=jnp.float32)
              + jnp.dot(act_ref[...], w1a_ref[...],
                        preferred_element_type=jnp.float32)
              + b1_ref[...])
        h1 = jnp.maximum(z1, 0.0).astype(jnp.bfloat16)
        z2 = (jnp.dot(h1, w2_ref[...], preferred_element_type=jnp.float32)
              + b2_ref[...])
        h2 = jnp.maximum(z2, 0.0).astype(jnp.bfloat16)
        pred_ref[...] = (jnp.dot(h2, w3_ref[...],
                                 preferred_element_type=jnp.float32)
                         + b3_ref[...])

    @pl.when(pl.program_id(0) != 0)
    def _():
        # Keep the (unused) next_x half of the pred output well-defined.
        pred_ref[...] = jnp.zeros_like(pred_ref)


# --------------------------------------------------------------------------
# Wrapper-side im2col (tiny strided gather; XLA fuses it).
# TODO(synk): im2col could move fully in-kernel via stride-2 ref slicing; kept
# wrapper-side since the dense slab is only ~1.3x the raw input size.
# --------------------------------------------------------------------------
def _im2col_nhwc(x_nhwc):
    B, H, W, C = x_nhwc.shape
    oh = (H - KH) // STRIDE + 1
    ow = (W - KW) // STRIDE + 1
    cols = []
    for i in range(KH):
        for j in range(KW):
            cols.append(
                x_nhwc[:, i:i + STRIDE * oh:STRIDE, j:j + STRIDE * ow:STRIDE, :])
    # patch feature order: (kh, kw, c) — matches conv_w row order.
    patches = jnp.concatenate(cols, axis=-1)                 # (B, oh, ow, KH*KW*C)
    return patches.reshape(B, oh * ow, KH * KW * C), oh, ow


# --------------------------------------------------------------------------
# One-time parameter packing: pad to lane/sublane-friendly sizes, split W1,
# cast MXU operands to bf16 (biases stay f32).  Pads are zeros so padded
# lanes stay 0 through every ReLU.
# --------------------------------------------------------------------------
def pack_params(raw):
    bf16, f32 = jnp.bfloat16, jnp.float32
    conv_w = raw["conv_w"]                       # (K, NF)
    K, NF = conv_w.shape
    KCP = _round_up(K, K_PAD)                    # dense: 36 -> 48, not 128
    fc_w = raw["fc_w"]                           # (P*NF, out_dim)
    out_dim = fc_w.shape[1]
    NP = _round_up(out_dim, LANES)
    w1 = raw["mlp_w1"]                           # (out_dim + A, hidden)
    hidden = w1.shape[1]
    HP = _round_up(hidden, LANES)                # MLP hidden padded 32 -> 128
    A = w1.shape[0] - out_dim
    AP = _round_up(A, LANES)

    def padw(w, r, c):
        return jnp.pad(w, ((0, r - w.shape[0]), (0, c - w.shape[1])))

    return dict(
        conv_w=padw(conv_w, KCP, NF).astype(bf16),
        conv_b=raw["conv_b"].reshape(1, NF).astype(f32),
        fc_w=padw(fc_w, fc_w.shape[0], NP).astype(bf16),
        fc_b=padw(raw["fc_b"].reshape(1, out_dim), 1, NP).astype(f32),
        w1h=padw(w1[:out_dim], NP, HP).astype(bf16),
        w1a=padw(w1[out_dim:], AP, HP).astype(bf16),
        b1=padw(raw["mlp_b1"].reshape(1, hidden), 1, HP).astype(f32),
        w2=padw(raw["mlp_w2"], HP, HP).astype(bf16),
        b2=padw(raw["mlp_b2"].reshape(1, hidden), 1, HP).astype(f32),
        w3=padw(raw["mlp_w3"], HP, NP).astype(bf16),
        b3=padw(raw["mlp_b3"].reshape(1, out_dim), 1, NP).astype(f32),
    )


# --------------------------------------------------------------------------
# ForwardDynamicPredictor forward pass (single fused pallas_call).
# --------------------------------------------------------------------------
def forward_dynamic_predictor(params, x, next_x, action, *, out_dim):
    B, C, H, W = x.shape
    KCP, NF = params["conv_w"].shape
    PNF, NP = params["fc_w"].shape
    P = PNF // NF
    AP = params["w1a"].shape[0]

    # Both frames through the encoder in one kernel: frame = grid axis 0.
    xs = jnp.stack([x, next_x], axis=0)                              # (2, B, C, H, W)
    xs = jnp.transpose(xs, (0, 1, 3, 4, 2)).astype(jnp.float32)      # NCHW -> NHWC
    pats, oh, ow = _im2col_nhwc(xs.reshape(2 * B, H, W, C))          # (2B, P, K)
    K = pats.shape[-1]
    assert oh * ow == P and K <= KCP
    pats = pats.reshape(2, B, P, K)
    pats = jnp.transpose(pats, (0, 2, 1, 3))                         # (2, P, B, K)

    # Per-frame row padding / blocking (always >= 2 grid steps via frame axis).
    Mh = _round_up(B, ROW_PAD)
    M_BLK = min(Mh, M_BLK_CAP)
    Mh = _round_up(Mh, M_BLK)
    n_row_blocks = Mh // M_BLK

    pats = jnp.pad(pats, ((0, 0), (0, 0), (0, Mh - B), (0, KCP - K))
                   ).astype(jnp.bfloat16)                            # (2, P, Mh, KCP)

    A = action.shape[1]
    act = jnp.pad(action.astype(jnp.float32),
                  ((0, Mh - B), (0, AP - A))).astype(jnp.bfloat16)   # (Mh, AP)

    def _const(shape):
        nd = len(shape)
        return pl.BlockSpec(shape, lambda f, i, _nd=nd: (0,) * _nd)

    in_specs = [
        pl.BlockSpec((None, P, M_BLK, KCP), lambda f, i: (f, 0, i, 0)),  # patches
        _const(params["conv_w"].shape),
        _const(params["conv_b"].shape),
        _const(params["fc_w"].shape),
        _const(params["fc_b"].shape),
        pl.BlockSpec((M_BLK, AP), lambda f, i: (i, 0)),                  # action
        _const(params["w1h"].shape),
        _const(params["w1a"].shape),
        _const(params["b1"].shape),
        _const(params["w2"].shape),
        _const(params["b2"].shape),
        _const(params["w3"].shape),
        _const(params["b3"].shape),
    ]
    out_specs = (pl.BlockSpec((None, M_BLK, NP), lambda f, i: (f, i, 0)),
                 pl.BlockSpec((None, M_BLK, NP), lambda f, i: (f, i, 0)))
    out_shape = (jax.ShapeDtypeStruct((2, Mh, NP), jnp.float32),
                 jax.ShapeDtypeStruct((2, Mh, NP), jnp.float32))

    pred_pad, hall_pad = pl.pallas_call(
        _fused_forward_kernel,
        out_shape=out_shape,
        grid=(2, n_row_blocks),
        in_specs=in_specs,
        out_specs=out_specs,
        scratch_shapes=[pltpu.VMEM((M_BLK, P * NF), jnp.bfloat16)],
        compiler_params=pltpu.CompilerParams(
            dimension_semantics=("parallel", "parallel")),
    )(pats,
      params["conv_w"], params["conv_b"], params["fc_w"], params["fc_b"],
      act,
      params["w1h"], params["w1a"], params["b1"],
      params["w2"], params["b2"], params["w3"], params["b3"])

    pred = pred_pad[0, :B, :out_dim]         # MLP output for the x frame
    h_next = hall_pad[1, :B, :out_dim]       # encoder features of next_x
    return pred, h_next


# --------------------------------------------------------------------------
# Deterministic parameter init (uniform fan-in scaling; synthetic weights).
# TODO(synk): the original module applies `weight_init` (orthogonal); any
# deterministic init is acceptable for this synthetic kernel.
# --------------------------------------------------------------------------
def init_params(key, *, in_channels, num_filters, conv_feat_dim, out_dim,
                action_dim_total, hidden_dim):
    def lin(k, fan_in, fan_out):
        kw, kb = jax.random.split(k)
        s = 1.0 / jnp.sqrt(jnp.float32(fan_in))
        w = jax.random.uniform(kw, (fan_in, fan_out), jnp.float32, -s, s)
        b = jax.random.uniform(kb, (fan_out,), jnp.float32, -s, s)
        return w, b

    k = jax.random.split(key, 5)
    conv_w, conv_b = lin(k[0], KH * KW * in_channels, num_filters)
    fc_w, fc_b = lin(k[1], conv_feat_dim, out_dim)
    mlp_w1, mlp_b1 = lin(k[2], out_dim + action_dim_total, hidden_dim)
    mlp_w2, mlp_b2 = lin(k[3], hidden_dim, hidden_dim)
    mlp_w3, mlp_b3 = lin(k[4], hidden_dim, out_dim)
    return dict(conv_w=conv_w, conv_b=conv_b, fc_w=fc_w, fc_b=fc_b,
                mlp_w1=mlp_w1, mlp_b1=mlp_b1, mlp_w2=mlp_w2, mlp_b2=mlp_b2,
                mlp_w3=mlp_w3, mlp_b3=mlp_b3)


# --------------------------------------------------------------------------
# Pure-JAX f32 reference (same flatten convention) for a loose sanity check.
# --------------------------------------------------------------------------
def reference_forward(raw, x, next_x, action):
    def encode(inp):
        xn = jnp.transpose(inp, (0, 2, 3, 1)).astype(jnp.float32)
        patches, oh, ow = _im2col_nhwc(xn)
        Bb = inp.shape[0]
        c = jnp.maximum(
            patches.reshape(Bb * oh * ow, -1) @ raw["conv_w"] + raw["conv_b"], 0.0)
        feat = c.reshape(Bb, -1)
        return feat @ raw["fc_w"] + raw["fc_b"]

    h = encode(x)
    hn = encode(next_x)
    z = jnp.concatenate([h, action.astype(jnp.float32)], axis=1)
    y = jnp.maximum(z @ raw["mlp_w1"] + raw["mlp_b1"], 0.0)
    y = jnp.maximum(y @ raw["mlp_w2"] + raw["mlp_b2"], 0.0)
    y = y @ raw["mlp_w3"] + raw["mlp_b3"]
    return y, hn


if __name__ == "__main__":
    # Small shapes consistent with the module's forward.
    B, C, H, W = 2, 4, 16, 16
    action_dim, accumulate_steps = 6, 1
    hidden_dim, out_dim, num_filters = 32, 32, 32

    oh = (H - KH) // STRIDE + 1
    ow = (W - KW) // STRIDE + 1
    conv_feat_dim = oh * ow * num_filters

    raw = init_params(
        jax.random.PRNGKey(42),
        in_channels=C, num_filters=num_filters, conv_feat_dim=conv_feat_dim,
        out_dim=out_dim, action_dim_total=action_dim * accumulate_steps,
        hidden_dim=hidden_dim)
    params = pack_params(raw)          # pad + bf16 once, outside the hot path

    key = jax.random.PRNGKey(0)
    kx, knx, ka = jax.random.split(key, 3)
    x = jax.random.normal(kx, (B, C, H, W), jnp.float32)       # NCHW (PyTorch layout)
    next_x = jax.random.normal(knx, (B, C, H, W), jnp.float32)
    action = jax.random.normal(ka, (B, action_dim * accumulate_steps), jnp.float32)

    fwd = jax.jit(functools.partial(forward_dynamic_predictor, out_dim=out_dim))
    pred, h_next = fwd(params, x, next_x, action)
    jax.block_until_ready((pred, h_next))

    assert pred.shape == (B, out_dim)
    assert h_next.shape == (B, out_dim)

    # Loose check vs f32 reference (kernel uses bf16 MXU operands, f32 accumulation).
    ref_pred, ref_hn = jax.jit(reference_forward)(raw, x, next_x, action)
    np.testing.assert_allclose(np.asarray(pred), np.asarray(ref_pred),
                               rtol=5e-2, atol=5e-2)
    np.testing.assert_allclose(np.asarray(h_next), np.asarray(ref_hn),
                               rtol=5e-2, atol=5e-2)

    print("KERNEL_OK")
</pallas_src>

<mosaic_0001>
module attributes {stable_mosaic.version = 11 : i64} {
  func.func @_fused_forward_kernel(%arg0: i32, %arg1: i32, %arg2: memref<1x49x16x48xbf16, #tpu.memory_space<vmem>>, %arg3: memref<48x32xbf16, #tpu.memory_space<vmem>>, %arg4: memref<1x32xf32, #tpu.memory_space<vmem>>, %arg5: memref<1568x128xbf16, #tpu.memory_space<vmem>>, %arg6: memref<1x128xf32, #tpu.memory_space<vmem>>, %arg7: memref<16x128xbf16, #tpu.memory_space<vmem>>, %arg8: memref<128x128xbf16, #tpu.memory_space<vmem>>, %arg9: memref<128x128xbf16, #tpu.memory_space<vmem>>, %arg10: memref<1x128xf32, #tpu.memory_space<vmem>>, %arg11: memref<128x128xbf16, #tpu.memory_space<vmem>>, %arg12: memref<1x128xf32, #tpu.memory_space<vmem>>, %arg13: memref<128x128xbf16, #tpu.memory_space<vmem>>, %arg14: memref<1x128xf32, #tpu.memory_space<vmem>>, %arg15: memref<1x16x128xf32, #tpu.memory_space<vmem>>, %arg16: memref<1x16x128xf32, #tpu.memory_space<vmem>>, %arg17: memref<16x1568xbf16, #tpu.memory_space<vmem>>) attributes {dimension_semantics = [#tpu.dimension_semantics<parallel>, #tpu.dimension_semantics<parallel>], iteration_bounds = array<i64: 2, 1>, scalar_prefetch = 0 : i64, scratch_operands = 1 : i64, tpu.core_type = #tpu.core_type<tc>, window_params = [{transform_indices = @transform_0, window_bounds = array<i64: 1, 49, 16, 48>}, {pipeline_mode = #tpu.pipeline_mode<synchronous>, transform_indices = @transform_1, window_bounds = array<i64: 48, 32>}, {pipeline_mode = #tpu.pipeline_mode<synchronous>, transform_indices = @transform_2, window_bounds = array<i64: 1, 32>}, {pipeline_mode = #tpu.pipeline_mode<synchronous>, transform_indices = @transform_3, window_bounds = array<i64: 1568, 128>}, {pipeline_mode = #tpu.pipeline_mode<synchronous>, transform_indices = @transform_4, window_bounds = array<i64: 1, 128>}, {transform_indices = @transform_5, window_bounds = array<i64: 16, 128>}, {pipeline_mode = #tpu.pipeline_mode<synchronous>, transform_indices = @transform_6, window_bounds = array<i64: 128, 128>}, {pipeline_mode = #tpu.pipeline_mode<synchronous>, transform_indices = @transform_7, window_bounds = array<i64: 128, 128>}, {pipeline_mode = #tpu.pipeline_mode<synchronous>, transform_indices = @transform_8, window_bounds = array<i64: 1, 128>}, {pipeline_mode = #tpu.pipeline_mode<synchronous>, transform_indices = @transform_9, window_bounds = array<i64: 128, 128>}, {pipeline_mode = #tpu.pipeline_mode<synchronous>, transform_indices = @transform_10, window_bounds = array<i64: 1, 128>}, {pipeline_mode = #tpu.pipeline_mode<synchronous>, transform_indices = @transform_11, window_bounds = array<i64: 128, 128>}, {pipeline_mode = #tpu.pipeline_mode<synchronous>, transform_indices = @transform_12, window_bounds = array<i64: 1, 128>}, {transform_indices = @transform_13, window_bounds = array<i64: 1, 16, 128>}, {transform_indices = @transform_14, window_bounds = array<i64: 1, 16, 128>}]} {
    %c0 = arith.constant 0 : index
    %c0_0 = arith.constant 0 : index
    %c0_1 = arith.constant 0 : index
    %c0_2 = arith.constant 0 : index
    %0 = vector.load %arg2[%c0, %c0_0, %c0_1, %c0_2] : memref<1x49x16x48xbf16, #tpu.memory_space<vmem>>, vector<1x49x16x48xbf16>
    %1 = vector.shape_cast %0 : vector<1x49x16x48xbf16> to vector<49x16x48xbf16>
    %2 = vector.shape_cast %1 : vector<49x16x48xbf16> to vector<784x48xbf16>
    %c0_3 = arith.constant 0 : index
    %c0_4 = arith.constant 0 : index
    %3 = vector.load %arg3[%c0_3, %c0_4] : memref<48x32xbf16, #tpu.memory_space<vmem>>, vector<48x32xbf16>
    %cst = arith.constant dense<0.000000e+00> : vector<784x32xf32>
    %4 = tpu.matmul %2, %3, %cst {dimension_numbers = #tpu.dot_dimension_numbers<[1], [0], [0], [1], [0, 0, 1, 1], [], []>} : vector<784x48xbf16>, vector<48x32xbf16>, vector<784x32xf32> -> vector<784x32xf32>
    %c0_5 = arith.constant 0 : index
    %c0_6 = arith.constant 0 : index
    %5 = vector.load %arg4[%c0_5, %c0_6] : memref<1x32xf32, #tpu.memory_space<vmem>>, vector<1x32xf32>
    %6 = vector.broadcast %5 : vector<1x32xf32> to vector<784x32xf32>
    %7 = arith.addf %4, %6 : vector<784x32xf32>
    %cst_7 = arith.constant 0.000000e+00 : f32
    %8 = vector.broadcast %cst_7 : f32 to vector<784x32xf32>
    %9 = arith.maximumf %7, %8 : vector<784x32xf32>
    %10 = arith.truncf %9 : vector<784x32xf32> to vector<784x32xbf16>
    %11 = vector.shape_cast %10 : vector<784x32xbf16> to vector<49x16x32xbf16>
    %12 = vector.extract_strided_slice %11 {offsets = [0, 0, 0], sizes = [1, 16, 32], strides = [1, 1, 1]} : vector<49x16x32xbf16> to vector<1x16x32xbf16>
    %13 = vector.shape_cast %12 : vector<1x16x32xbf16> to vector<16x32xbf16>
    %c0_8 = arith.constant 0 : index
    %c0_9 = arith.constant 0 : index
    %14 = vector.load %arg17[%c0_8, %c0_9] : memref<16x1568xbf16, #tpu.memory_space<vmem>>, vector<16x32xbf16>
    tpu.vector_store %arg17[%c0_8, %c0_9], %13 {strides = array<i32>} : memref<16x1568xbf16, #tpu.memory_space<vmem>>, vector<16x32xbf16>,
    %15 = vector.extract_strided_slice %11 {offsets = [1, 0, 0], sizes = [1, 16, 32], strides = [1, 1, 1]} : vector<49x16x32xbf16> to vector<1x16x32xbf16>
    %16 = vector.shape_cast %15 : vector<1x16x32xbf16> to vector<16x32xbf16>
    %c0_10 = arith.constant 0 : index
    %c32 = arith.constant 32 : index
    %17 = vector.load %arg17[%c0_10, %c32] : memref<16x1568xbf16, #tpu.memory_space<vmem>>, vector<16x32xbf16>
    tpu.vector_store %arg17[%c0_10, %c32], %16 {strides = array<i32>} : memref<16x1568xbf16, #tpu.memory_space<vmem>>, vector<16x32xbf16>,
    %18 = vector.extract_strided_slice %11 {offsets = [2, 0, 0], sizes = [1, 16, 32], strides = [1, 1, 1]} : vector<49x16x32xbf16> to vector<1x16x32xbf16>
    %19 = vector.shape_cast %18 : vector<1x16x32xbf16> to vector<16x32xbf16>
    %c0_11 = arith.constant 0 : index
    %c64 = arith.constant 64 : index
    %20 = vector.load %arg17[%c0_11, %c64] : memref<16x1568xbf16, #tpu.memory_space<vmem>>, vector<16x32xbf16>
    tpu.vector_store %arg17[%c0_11, %c64], %19 {strides = array<i32>} : memref<16x1568xbf16, #tpu.memory_space<vmem>>, vector<16x32xbf16>,
    %21 = vector.extract_strided_slice %11 {offsets = [3, 0, 0], sizes = [1, 16, 32], strides = [1, 1, 1]} : vector<49x16x32xbf16> to vector<1x16x32xbf16>
    %22 = vector.shape_cast %21 : vector<1x16x32xbf16> to vector<16x32xbf16>
    %c0_12 = arith.constant 0 : index
    %c96 = arith.constant 96 : index
    %23 = vector.load %arg17[%c0_12, %c96] : memref<16x1568xbf16, #tpu.memory_space<vmem>>, vector<16x32xbf16>
    tpu.vector_store %arg17[%c0_12, %c96], %22 {strides = array<i32>} : memref<16x1568xbf16, #tpu.memory_space<vmem>>, vector<16x32xbf16>,
    %24 = vector.extract_strided_slice %11 {offsets = [4, 0, 0], sizes = [1, 16, 32], strides = [1, 1, 1]} : vector<49x16x32xbf16> to vector<1x16x32xbf16>
    %25 = vector.shape_cast %24 : vector<1x16x32xbf16> to vector<16x32xbf16>
    %c0_13 = arith.constant 0 : index
    %c128 = arith.constant 128 : index
    %26 = vector.load %arg17[%c0_13, %c128] : memref<16x1568xbf16, #tpu.memory_space<vmem>>, vector<16x32xbf16>
    tpu.vector_store %arg17[%c0_13, %c128], %25 {strides = array<i32>} : memref<16x1568xbf16, #tpu.memory_space<vmem>>, vector<16x32xbf16>,
    %27 = vector.extract_strided_slice %11 {offsets = [5, 0, 0], sizes = [1, 16, 32], strides = [1, 1, 1]} : vector<49x16x32xbf16> to vector<1x16x32xbf16>
    %28 = vector.shape_cast %27 : vector<1x16x32xbf16> to vector<16x32xbf16>
    %c0_14 = arith.constant 0 : index
    %c160 = arith.constant 160 : index
    %29 = vector.load %arg17[%c0_14, %c160] : memref<16x1568xbf16, #tpu.memory_space<vmem>>, vector<16x32xbf16>
    tpu.vector_store %arg17[%c0_14, %c160], %28 {strides = array<i32>} : memref<16x1568xbf16, #tpu.memory_space<vmem>>, vector<16x32xbf16>,
    %30 = vector.extract_strided_slice %11 {offsets = [6, 0, 0], sizes = [1, 16, 32], strides = [1, 1, 1]} : vector<49x16x32xbf16> to vector<1x16x32xbf16>
    %31 = vector.shape_cast %30 : vector<1x16x32xbf16> to vector<16x32xbf16>
    %c0_15 = arith.constant 0 : index
    %c192 = arith.constant 192 : index
    %32 = vector.load %arg17[%c0_15, %c192] : memref<16x1568xbf16, #tpu.memory_space<vmem>>, vector<16x32xbf16>
    tpu.vector_store %arg17[%c0_15, %c192], %31 {strides = array<i32>} : memref<16x1568xbf16, #tpu.memory_space<vmem>>, vector<16x32xbf16>,
    %33 = vector.extract_strided_slice %11 {offsets = [7, 0, 0], sizes = [1, 16, 32], strides = [1, 1, 1]} : vector<49x16x32xbf16> to vector<1x16x32xbf16>
    %34 = vector.shape_cast %33 : vector<1x16x32xbf16> to vector<16x32xbf16>
    %c0_16 = arith.constant 0 : index
    %c224 = arith.constant 224 : index
    %35 = vector.load %arg17[%c0_16, %c224] : memref<16x1568xbf16, #tpu.memory_space<vmem>>, vector<16x32xbf16>
    tpu.vector_store %arg17[%c0_16, %c224], %34 {strides = array<i32>} : memref<16x1568xbf16, #tpu.memory_space<vmem>>, vector<16x32xbf16>,
    %36 = vector.extract_strided_slice %11 {offsets = [8, 0, 0], sizes = [1, 16, 32], strides = [1, 1, 1]} : vector<49x16x32xbf16> to vector<1x16x32xbf16>
    %37 = vector.shape_cast %36 : vector<1x16x32xbf16> to vector<16x32xbf16>
    %c0_17 = arith.constant 0 : index
    %c256 = arith.constant 256 : index
    %38 = vector.load %arg17[%c0_17, %c256] : memref<16x1568xbf16, #tpu.memory_space<vmem>>, vector<16x32xbf16>
    tpu.vector_store %arg17[%c0_17, %c256], %37 {strides = array<i32>} : memref<16x1568xbf16, #tpu.memory_space<vmem>>, vector<16x32xbf16>,
    %39 = vector.extract_strided_slice %11 {offsets = [9, 0, 0], sizes = [1, 16, 32], strides = [1, 1, 1]} : vector<49x16x32xbf16> to vector<1x16x32xbf16>
    %40 = vector.shape_cast %39 : vector<1x16x32xbf16> to vector<16x32xbf16>
    %c0_18 = arith.constant 0 : index
    %c288 = arith.constant 288 : index
    %41 = vector.load %arg17[%c0_18, %c288] : memref<16x1568xbf16, #tpu.memory_space<vmem>>, vector<16x32xbf16>
    tpu.vector_store %arg17[%c0_18, %c288], %40 {strides = array<i32>} : memref<16x1568xbf16, #tpu.memory_space<vmem>>, vector<16x32xbf16>,
    %42 = vector.extract_strided_slice %11 {offsets = [10, 0, 0], sizes = [1, 16, 32], strides = [1, 1, 1]} : vector<49x16x32xbf16> to vector<1x16x32xbf16>
    %43 = vector.shape_cast %42 : vector<1x16x32xbf16> to vector<16x32xbf16>
    %c0_19 = arith.constant 0 : index
    %c320 = arith.constant 320 : index
    %44 = vector.load %arg17[%c0_19, %c320] : memref<16x1568xbf16, #tpu.memory_space<vmem>>, vector<16x32xbf16>
    tpu.vector_store %arg17[%c0_19, %c320], %43 {strides = array<i32>} : memref<16x1568xbf16, #tpu.memory_space<vmem>>, vector<16x32xbf16>,
    %45 = vector.extract_strided_slice %11 {offsets = [11, 0, 0], sizes = [1, 16, 32], strides = [1, 1, 1]} : vector<49x16x32xbf16> to vector<1x16x32xbf16>
    %46 = vector.shape_cast %45 : vector<1x16x32xbf16> to vector<16x32xbf16>
    %c0_20 = arith.constant 0 : index
    %c352 = arith.constant 352 : index
    %47 = vector.load %arg17[%c0_20, %c352] : memref<16x1568xbf16, #tpu.memory_space<vmem>>, vector<16x32xbf16>
    tpu.vector_store %arg17[%c0_20, %c352], %46 {strides = array<i32>} : memref<16x1568xbf16, #tpu.memory_space<vmem>>, vector<16x32xbf16>,
    %48 = vector.extract_strided_slice %11 {offsets = [12, 0, 0], sizes = [1, 16, 32], strides = [1, 1, 1]} : vector<49x16x32xbf16> to vector<1x16x32xbf16>
    %49 = vector.shape_cast %48 : vector<1x16x32xbf16> to vector<16x32xbf16>
    %c0_21 = arith.constant 0 : index
    %c384 = arith.constant 384 : index
    %50 = vector.load %arg17[%c0_21, %c384] : memref<16x1568xbf16, #tpu.memory_space<vmem>>, vector<16x32xbf16>
    tpu.vector_store %arg17[%c0_21, %c384], %49 {strides = array<i32>} : memref<16x1568xbf16, #tpu.memory_space<vmem>>, vector<16x32xbf16>,
    %51 = vector.extract_strided_slice %11 {offsets = [13, 0, 0], sizes = [1, 16, 32], strides = [1, 1, 1]} : vector<49x16x32xbf16> to vector<1x16x32xbf16>
    %52 = vector.shape_cast %51 : vector<1x16x32xbf16> to vector<16x32xbf16>
    %c0_22 = arith.constant 0 : index
    %c416 = arith.constant 416 : index
    %53 = vector.load %arg17[%c0_22, %c416] : memref<16x1568xbf16, #tpu.memory_space<vmem>>, vector<16x32xbf16>
    tpu.vector_store %arg17[%c0_22, %c416], %52 {strides = array<i32>} : memref<16x1568xbf16, #tpu.memory_space<vmem>>, vector<16x32xbf16>,
    %54 = vector.extract_strided_slice %11 {offsets = [14, 0, 0], sizes = [1, 16, 32], strides = [1, 1, 1]} : vector<49x16x32xbf16> to vector<1x16x32xbf16>
    %55 = vector.shape_cast %54 : vector<1x16x32xbf16> to vector<16x32xbf16>
    %c0_23 = arith.constant 0 : index
    %c448 = arith.constant 448 : index
    %56 = vector.load %arg17[%c0_23, %c448] : memref<16x1568xbf16, #tpu.memory_space<vmem>>, vector<16x32xbf16>
    tpu.vector_store %arg17[%c0_23, %c448], %55 {strides = array<i32>} : memref<16x1568xbf16, #tpu.memory_space<vmem>>, vector<16x32xbf16>,
    %57 = vector.extract_strided_slice %11 {offsets = [15, 0, 0], sizes = [1, 16, 32], strides = [1, 1, 1]} : vector<49x16x32xbf16> to vector<1x16x32xbf16>
    %58 = vector.shape_cast %57 : vector<1x16x32xbf16> to vector<16x32xbf16>
    %c0_24 = arith.constant 0 : index
    %c480 = arith.constant 480 : index
    %59 = vector.load %arg17[%c0_24, %c480] : memref<16x1568xbf16, #tpu.memory_space<vmem>>, vector<16x32xbf16>
    tpu.vector_store %arg17[%c0_24, %c480], %58 {strides = array<i32>} : memref<16x1568xbf16, #tpu.memory_space<vmem>>, vector<16x32xbf16>,
    %60 = vector.extract_strided_slice %11 {offsets = [16, 0, 0], sizes = [1, 16, 32], strides = [1, 1, 1]} : vector<49x16x32xbf16> to vector<1x16x32xbf16>
    %61 = vector.shape_cast %60 : vector<1x16x32xbf16> to vector<16x32xbf16>
    %c0_25 = arith.constant 0 : index
    %c512 = arith.constant 512 : index
    %62 = vector.load %arg17[%c0_25, %c512] : memref<16x1568xbf16, #tpu.memory_space<vmem>>, vector<16x32xbf16>
    tpu.vector_store %arg17[%c0_25, %c512], %61 {strides = array<i32>} : memref<16x1568xbf16, #tpu.memory_space<vmem>>, vector<16x32xbf16>,
    %63 = vector.extract_strided_slice %11 {offsets = [17, 0, 0], sizes = [1, 16, 32], strides = [1, 1, 1]} : vector<49x16x32xbf16> to vector<1x16x32xbf16>
    %64 = vector.shape_cast %63 : vector<1x16x32xbf16> to vector<16x32xbf16>
    %c0_26 = arith.constant 0 : index
    %c544 = arith.constant 544 : index
    %65 = vector.load %arg17[%c0_26, %c544] : memref<16x1568xbf16, #tpu.memory_space<vmem>>, vector<16x32xbf16>
    tpu.vector_store %arg17[%c0_26, %c544], %64 {strides = array<i32>} : memref<16x1568xbf16, #tpu.memory_space<vmem>>, vector<16x32xbf16>,
    %66 = vector.extract_strided_slice %11 {offsets = [18, 0, 0], sizes = [1, 16, 32], strides = [1, 1, 1]} : vector<49x16x32xbf16> to vector<1x16x32xbf16>
    %67 = vector.shape_cast %66 : vector<1x16x32xbf16> to vector<16x32xbf16>
    %c0_27 = arith.constant 0 : index
    %c576 = arith.constant 576 : index
    %68 = vector.load %arg17[%c0_27, %c576] : memref<16x1568xbf16, #tpu.memory_space<vmem>>, vector<16x32xbf16>
    tpu.vector_store %arg17[%c0_27, %c576], %67 {strides = array<i32>} : memref<16x1568xbf16, #tpu.memory_space<vmem>>, vector<16x32xbf16>,
    %69 = vector.extract_strided_slice %11 {offsets = [19, 0, 0], sizes = [1, 16, 32], strides = [1, 1, 1]} : vector<49x16x32xbf16> to vector<1x16x32xbf16>
    %70 = vector.shape_cast %69 : vector<1x16x32xbf16> to vector<16x32xbf16>
    %c0_28 = arith.constant 0 : index
    %c608 = arith.constant 608 : index
    %71 = vector.load %arg17[%c0_28, %c608] : memref<16x1568xbf16, #tpu.memory_space<vmem>>, vector<16x32xbf16>
    tpu.vector_store %arg17[%c0_28, %c608], %70 {strides = array<i32>} : memref<16x1568xbf16, #tpu.memory_space<vmem>>, vector<16x32xbf16>,
    %72 = vector.extract_strided_slice %11 {offsets = [20, 0, 0], sizes = [1, 16, 32], strides = [1, 1, 1]} : vector<49x16x32xbf16> to vector<1x16x32xbf16>
    %73 = vector.shape_cast %72 : vector<1x16x32xbf16> to vector<16x32xbf16>
    %c0_29 = arith.constant 0 : index
    %c640 = arith.constant 640 : index
    %74 = vector.load %arg17[%c0_29, %c640] : memref<16x1568xbf16, #tpu.memory_space<vmem>>, vector<16x32xbf16>
    tpu.vector_store %arg17[%c0_29, %c640], %73 {strides = array<i32>} : memref<16x1568xbf16, #tpu.memory_space<vmem>>, vector<16x32xbf16>,
    %75 = vector.extract_strided_slice %11 {offsets = [21, 0, 0], sizes = [1, 16, 32], strides = [1, 1, 1]} : vector<49x16x32xbf16> to vector<1x16x32xbf16>
    %76 = vector.shape_cast %75 : vector<1x16x32xbf16> to vector<16x32xbf16>
    %c0_30 = arith.constant 0 : index
    %c672 = arith.constant 672 : index
    %77 = vector.load %arg17[%c0_30, %c672] : memref<16x1568xbf16, #tpu.memory_space<vmem>>, vector<16x32xbf16>
    tpu.vector_store %arg17[%c0_30, %c672], %76 {strides = array<i32>} : memref<16x1568xbf16, #tpu.memory_space<vmem>>, vector<16x32xbf16>,
    %78 = vector.extract_strided_slice %11 {offsets = [22, 0, 0], sizes = [1, 16, 32], strides = [1, 1, 1]} : vector<49x16x32xbf16> to vector<1x16x32xbf16>
    %79 = vector.shape_cast %78 : vector<1x16x32xbf16> to vector<16x32xbf16>
    %c0_31 = arith.constant 0 : index
    %c704 = arith.constant 704 : index
    %80 = vector.load %arg17[%c0_31, %c704] : memref<16x1568xbf16, #tpu.memory_space<vmem>>, vector<16x32xbf16>
    tpu.vector_store %arg17[%c0_31, %c704], %79 {strides = array<i32>} : memref<16x1568xbf16, #tpu.memory_space<vmem>>, vector<16x32xbf16>,
    %81 = vector.extract_strided_slice %11 {offsets = [23, 0, 0], sizes = [1, 16, 32], strides = [1, 1, 1]} : vector<49x16x32xbf16> to vector<1x16x32xbf16>
    %82 = vector.shape_cast %81 : vector<1x16x32xbf16> to vector<16x32xbf16>
    %c0_32 = arith.constant 0 : index
    %c736 = arith.constant 736 : index
    %83 = vector.load %arg17[%c0_32, %c736] : memref<16x1568xbf16, #tpu.memory_space<vmem>>, vector<16x32xbf16>
    tpu.vector_store %arg17[%c0_32, %c736], %82 {strides = array<i32>} : memref<16x1568xbf16, #tpu.memory_space<vmem>>, vector<16x32xbf16>,
    %84 = vector.extract_strided_slice %11 {offsets = [24, 0, 0], sizes = [1, 16, 32], strides = [1, 1, 1]} : vector<49x16x32xbf16> to vector<1x16x32xbf16>
    %85 = vector.shape_cast %84 : vector<1x16x32xbf16> to vector<16x32xbf16>
    %c0_33 = arith.constant 0 : index
    %c768 = arith.constant 768 : index
    %86 = vector.load %arg17[%c0_33, %c768] : memref<16x1568xbf16, #tpu.memory_space<vmem>>, vector<16x32xbf16>
    tpu.vector_store %arg17[%c0_33, %c768], %85 {strides = array<i32>} : memref<16x1568xbf16, #tpu.memory_space<vmem>>, vector<16x32xbf16>,
    %87 = vector.extract_strided_slice %11 {offsets = [25, 0, 0], sizes = [1, 16, 32], strides = [1, 1, 1]} : vector<49x16x32xbf16> to vector<1x16x32xbf16>
    %88 = vector.shape_cast %87 : vector<1x16x32xbf16> to vector<16x32xbf16>
    %c0_34 = arith.constant 0 : index
    %c800 = arith.constant 800 : index
    %89 = vector.load %arg17[%c0_34, %c800] : memref<16x1568xbf16, #tpu.memory_space<vmem>>, vector<16x32xbf16>
    tpu.vector_store %arg17[%c0_34, %c800], %88 {strides = array<i32>} : memref<16x1568xbf16, #tpu.memory_space<vmem>>, vector<16x32xbf16>,
    %90 = vector.extract_strided_slice %11 {offsets = [26, 0, 0], sizes = [1, 16, 32], strides = [1, 1, 1]} : vector<49x16x32xbf16> to vector<1x16x32xbf16>
    %91 = vector.shape_cast %90 : vector<1x16x32xbf16> to vector<16x32xbf16>
    %c0_35 = arith.constant 0 : index
    %c832 = arith.constant 832 : index
    %92 = vector.load %arg17[%c0_35, %c832] : memref<16x1568xbf16, #tpu.memory_space<vmem>>, vector<16x32xbf16>
    tpu.vector_store %arg17[%c0_35, %c832], %91 {strides = array<i32>} : memref<16x1568xbf16, #tpu.memory_space<vmem>>, vector<16x32xbf16>,
    %93 = vector.extract_strided_slice %11 {offsets = [27, 0, 0], sizes = [1, 16, 32], strides = [1, 1, 1]} : vector<49x16x32xbf16> to vector<1x16x32xbf16>
    %94 = vector.shape_cast %93 : vector<1x16x32xbf16> to vector<16x32xbf16>
    %c0_36 = arith.constant 0 : index
    %c864 = arith.constant 864 : index
    %95 = vector.load %arg17[%c0_36, %c864] : memref<16x1568xbf16, #tpu.memory_space<vmem>>, vector<16x32xbf16>
    tpu.vector_store %arg17[%c0_36, %c864], %94 {strides = array<i32>} : memref<16x1568xbf16, #tpu.memory_space<vmem>>, vector<16x32xbf16>,
    %96 = vector.extract_strided_slice %11 {offsets = [28, 0, 0], sizes = [1, 16, 32], strides = [1, 1, 1]} : vector<49x16x32xbf16> to vector<1x16x32xbf16>
    %97 = vector.shape_cast %96 : vector<1x16x32xbf16> to vector<16x32xbf16>
    %c0_37 = arith.constant 0 : index
    %c896 = arith.constant 896 : index
    %98 = vector.load %arg17[%c0_37, %c896] : memref<16x1568xbf16, #tpu.memory_space<vmem>>, vector<16x32xbf16>
    tpu.vector_store %arg17[%c0_37, %c896], %97 {strides = array<i32>} : memref<16x1568xbf16, #tpu.memory_space<vmem>>, vector<16x32xbf16>,
    %99 = vector.extract_strided_slice %11 {offsets = [29, 0, 0], sizes = [1, 16, 32], strides = [1, 1, 1]} : vector<49x16x32xbf16> to vector<1x16x32xbf16>
    %100 = vector.shape_cast %99 : vector<1x16x32xbf16> to vector<16x32xbf16>
    %c0_38 = arith.constant 0 : index
    %c928 = arith.constant 928 : index
    %101 = vector.load %arg17[%c0_38, %c928] : memref<16x1568xbf16, #tpu.memory_space<vmem>>, vector<16x32xbf16>
    tpu.vector_store %arg17[%c0_38, %c928], %100 {strides = array<i32>} : memref<16x1568xbf16, #tpu.memory_space<vmem>>, vector<16x32xbf16>,
    %102 = vector.extract_strided_slice %11 {offsets = [30, 0, 0], sizes = [1, 16, 32], strides = [1, 1, 1]} : vector<49x16x32xbf16> to vector<1x16x32xbf16>
    %103 = vector.shape_cast %102 : vector<1x16x32xbf16> to vector<16x32xbf16>
    %c0_39 = arith.constant 0 : index
    %c960 = arith.constant 960 : index
    %104 = vector.load %arg17[%c0_39, %c960] : memref<16x1568xbf16, #tpu.memory_space<vmem>>, vector<16x32xbf16>
    tpu.vector_store %arg17[%c0_39, %c960], %103 {strides = array<i32>} : memref<16x1568xbf16, #tpu.memory_space<vmem>>, vector<16x32xbf16>,
    %105 = vector.extract_strided_slice %11 {offsets = [31, 0, 0], sizes = [1, 16, 32], strides = [1, 1, 1]} : vector<49x16x32xbf16> to vector<1x16x32xbf16>
    %106 = vector.shape_cast %105 : vector<1x16x32xbf16> to vector<16x32xbf16>
    %c0_40 = arith.constant 0 : index
    %c992 = arith.constant 992 : index
    %107 = vector.load %arg17[%c0_40, %c992] : memref<16x1568xbf16, #tpu.memory_space<vmem>>, vector<16x32xbf16>
    tpu.vector_store %arg17[%c0_40, %c992], %106 {strides = array<i32>} : memref<16x1568xbf16, #tpu.memory_space<vmem>>, vector<16x32xbf16>,
    %108 = vector.extract_strided_slice %11 {offsets = [32, 0, 0], sizes = [1, 16, 32], strides = [1, 1, 1]} : vector<49x16x32xbf16> to vector<1x16x32xbf16>
    %109 = vector.shape_cast %108 : vector<1x16x32xbf16> to vector<16x32xbf16>
    %c0_41 = arith.constant 0 : index
    %c1024 = arith.constant 1024 : index
    %110 = vector.load %arg17[%c0_41, %c1024] : memref<16x1568xbf16, #tpu.memory_space<vmem>>, vector<16x32xbf16>
    tpu.vector_store %arg17[%c0_41, %c1024], %109 {strides = array<i32>} : memref<16x1568xbf16, #tpu.memory_space<vmem>>, vector<16x32xbf16>,
    %111 = vector.extract_strided_slice %11 {offsets = [33, 0, 0], sizes = [1, 16, 32], strides = [1, 1, 1]} : vector<49x16x32xbf16> to vector<1x16x32xbf16>
    %112 = vector.shape_cast %111 : vector<1x16x32xbf16> to vector<16x32xbf16>
    %c0_42 = arith.constant 0 : index
    %c1056 = arith.constant 1056 : index
    %113 = vector.load %arg17[%c0_42, %c1056] : memref<16x1568xbf16, #tpu.memory_space<vmem>>, vector<16x32xbf16>
    tpu.vector_store %arg17[%c0_42, %c1056], %112 {strides = array<i32>} : memref<16x1568xbf16, #tpu.memory_space<vmem>>, vector<16x32xbf16>,
    %114 = vector.extract_strided_slice %11 {offsets = [34, 0, 0], sizes = [1, 16, 32], strides = [1, 1, 1]} : vector<49x16x32xbf16> to vector<1x16x32xbf16>
    %115 = vector.shape_cast %114 : vector<1x16x32xbf16> to vector<16x32xbf16>
    %c0_43 = arith.constant 0 : index
    %c1088 = arith.constant 1088 : index
    %116 = vector.load %arg17[%c0_43, %c1088] : memref<16x1568xbf16, #tpu.memory_space<vmem>>, vector<16x32xbf16>
    tpu.vector_store %arg17[%c0_43, %c1088], %115 {strides = array<i32>} : memref<16x1568xbf16, #tpu.memory_space<vmem>>, vector<16x32xbf16>,
    %117 = vector.extract_strided_slice %11 {offsets = [35, 0, 0], sizes = [1, 16, 32], strides = [1, 1, 1]} : vector<49x16x32xbf16> to vector<1x16x32xbf16>
    %118 = vector.shape_cast %117 : vector<1x16x32xbf16> to vector<16x32xbf16>
    %c0_44 = arith.constant 0 : index
    %c1120 = arith.constant 1120 : index
    %119 = vector.load %arg17[%c0_44, %c1120] : memref<16x1568xbf16, #tpu.memory_space<vmem>>, vector<16x32xbf16>
    tpu.vector_store %arg17[%c0_44, %c1120], %118 {strides = array<i32>} : memref<16x1568xbf16, #tpu.memory_space<vmem>>, vector<16x32xbf16>,
    %120 = vector.extract_strided_slice %11 {offsets = [36, 0, 0], sizes = [1, 16, 32], strides = [1, 1, 1]} : vector<49x16x32xbf16> to vector<1x16x32xbf16>
    %121 = vector.shape_cast %120 : vector<1x16x32xbf16> to vector<16x32xbf16>
    %c0_45 = arith.constant 0 : index
    %c1152 = arith.constant 1152 : index
    %122 = vector.load %arg17[%c0_45, %c1152] : memref<16x1568xbf16, #tpu.memory_space<vmem>>, vector<16x32xbf16>
    tpu.vector_store %arg17[%c0_45, %c1152], %121 {strides = array<i32>} : memref<16x1568xbf16, #tpu.memory_space<vmem>>, vector<16x32xbf16>,
    %123 = vector.extract_strided_slice %11 {offsets = [37, 0, 0], sizes = [1, 16, 32], strides = [1, 1, 1]} : vector<49x16x32xbf16> to vector<1x16x32xbf16>
    %124 = vector.shape_cast %123 : vector<1x16x32xbf16> to vector<16x32xbf16>
    %c0_46 = arith.constant 0 : index
    %c1184 = arith.constant 1184 : index
    %125 = vector.load %arg17[%c0_46, %c1184] : memref<16x1568xbf16, #tpu.memory_space<vmem>>, vector<16x32xbf16>
    tpu.vector_store %arg17[%c0_46, %c1184], %124 {strides = array<i32>} : memref<16x1568xbf16, #tpu.memory_space<vmem>>, vector<16x32xbf16>,
    %126 = vector.extract_strided_slice %11 {offsets = [38, 0, 0], sizes = [1, 16, 32], strides = [1, 1, 1]} : vector<49x16x32xbf16> to vector<1x16x32xbf16>
    %127 = vector.shape_cast %126 : vector<1x16x32xbf16> to vector<16x32xbf16>
    %c0_47 = arith.constant 0 : index
    %c1216 = arith.constant 1216 : index
    %128 = vector.load %arg17[%c0_47, %c1216] : memref<16x1568xbf16, #tpu.memory_space<vmem>>, vector<16x32xbf16>
    tpu.vector_store %arg17[%c0_47, %c1216], %127 {strides = array<i32>} : memref<16x1568xbf16, #tpu.memory_space<vmem>>, vector<16x32xbf16>,
    %129 = vector.extract_strided_slice %11 {offsets = [39, 0, 0], sizes = [1, 16, 32], strides = [1, 1, 1]} : vector<49x16x32xbf16> to vector<1x16x32xbf16>
    %130 = vector.shape_cast %129 : vector<1x16x32xbf16> to vector<16x32xbf16>
    %c0_48 = arith.constant 0 : index
    %c1248 = arith.constant 1248 : index
    %131 = vector.load %arg17[%c0_48, %c1248] : memref<16x1568xbf16, #tpu.memory_space<vmem>>, vector<16x32xbf16>
    tpu.vector_store %arg17[%c0_48, %c1248], %130 {strides = array<i32>} : memref<16x1568xbf16, #tpu.memory_space<vmem>>, vector<16x32xbf16>,
    %132 = vector.extract_strided_slice %11 {offsets = [40, 0, 0], sizes = [1, 16, 32], strides = [1, 1, 1]} : vector<49x16x32xbf16> to vector<1x16x32xbf16>
    %133 = vector.shape_cast %132 : vector<1x16x32xbf16> to vector<16x32xbf16>
    %c0_49 = arith.constant 0 : index
    %c1280 = arith.constant 1280 : index
    %134 = vector.load %arg17[%c0_49, %c1280] : memref<16x1568xbf16, #tpu.memory_space<vmem>>, vector<16x32xbf16>
    tpu.vector_store %arg17[%c0_49, %c1280], %133 {strides = array<i32>} : memref<16x1568xbf16, #tpu.memory_space<vmem>>, vector<16x32xbf16>,
    %135 = vector.extract_strided_slice %11 {offsets = [41, 0, 0], sizes = [1, 16, 32], strides = [1, 1, 1]} : vector<49x16x32xbf16> to vector<1x16x32xbf16>
    %136 = vector.shape_cast %135 : vector<1x16x32xbf16> to vector<16x32xbf16>
    %c0_50 = arith.constant 0 : index
    %c1312 = arith.constant 1312 : index
    %137 = vector.load %arg17[%c0_50, %c1312] : memref<16x1568xbf16, #tpu.memory_space<vmem>>, vector<16x32xbf16>
    tpu.vector_store %arg17[%c0_50, %c1312], %136 {strides = array<i32>} : memref<16x1568xbf16, #tpu.memory_space<vmem>>, vector<16x32xbf16>,
    %138 = vector.extract_strided_slice %11 {offsets = [42, 0, 0], sizes = [1, 16, 32], strides = [1, 1, 1]} : vector<49x16x32xbf16> to vector<1x16x32xbf16>
    %139 = vector.shape_cast %138 : vector<1x16x32xbf16> to vector<16x32xbf16>
    %c0_51 = arith.constant 0 : index
    %c1344 = arith.constant 1344 : index
    %140 = vector.load %arg17[%c0_51, %c1344] : memref<16x1568xbf16, #tpu.memory_space<vmem>>, vector<16x32xbf16>
    tpu.vector_store %arg17[%c0_51, %c1344], %139 {strides = array<i32>} : memref<16x1568xbf16, #tpu.memory_space<vmem>>, vector<16x32xbf16>,
    %141 = vector.extract_strided_slice %11 {offsets = [43, 0, 0], sizes = [1, 16, 32], strides = [1, 1, 1]} : vector<49x16x32xbf16> to vector<1x16x32xbf16>
    %142 = vector.shape_cast %141 : vector<1x16x32xbf16> to vector<16x32xbf16>
    %c0_52 = arith.constant 0 : index
    %c1376 = arith.constant 1376 : index
    %143 = vector.load %arg17[%c0_52, %c1376] : memref<16x1568xbf16, #tpu.memory_space<vmem>>, vector<16x32xbf16>
    tpu.vector_store %arg17[%c0_52, %c1376], %142 {strides = array<i32>} : memref<16x1568xbf16, #tpu.memory_space<vmem>>, vector<16x32xbf16>,
    %144 = vector.extract_strided_slice %11 {offsets = [44, 0, 0], sizes = [1, 16, 32], strides = [1, 1, 1]} : vector<49x16x32xbf16> to vector<1x16x32xbf16>
    %145 = vector.shape_cast %144 : vector<1x16x32xbf16> to vector<16x32xbf16>
    %c0_53 = arith.constant 0 : index
    %c1408 = arith.constant 1408 : index
    %146 = vector.load %arg17[%c0_53, %c1408] : memref<16x1568xbf16, #tpu.memory_space<vmem>>, vector<16x32xbf16>
    tpu.vector_store %arg17[%c0_53, %c1408], %145 {strides = array<i32>} : memref<16x1568xbf16, #tpu.memory_space<vmem>>, vector<16x32xbf16>,
    %147 = vector.extract_strided_slice %11 {offsets = [45, 0, 0], sizes = [1, 16, 32], strides = [1, 1, 1]} : vector<49x16x32xbf16> to vector<1x16x32xbf16>
    %148 = vector.shape_cast %147 : vector<1x16x32xbf16> to vector<16x32xbf16>
    %c0_54 = arith.constant 0 : index
    %c1440 = arith.constant 1440 : index
    %149 = vector.load %arg17[%c0_54, %c1440] : memref<16x1568xbf16, #tpu.memory_space<vmem>>, vector<16x32xbf16>
    tpu.vector_store %arg17[%c0_54, %c1440], %148 {strides = array<i32>} : memref<16x1568xbf16, #tpu.memory_space<vmem>>, vector<16x32xbf16>,
    %150 = vector.extract_strided_slice %11 {offsets = [46, 0, 0], sizes = [1, 16, 32], strides = [1, 1, 1]} : vector<49x16x32xbf16> to vector<1x16x32xbf16>
    %151 = vector.shape_cast %150 : vector<1x16x32xbf16> to vector<16x32xbf16>
    %c0_55 = arith.constant 0 : index
    %c1472 = arith.constant 1472 : index
    %152 = vector.load %arg17[%c0_55, %c1472] : memref<16x1568xbf16, #tpu.memory_space<vmem>>, vector<16x32xbf16>
    tpu.vector_store %arg17[%c0_55, %c1472], %151 {strides = array<i32>} : memref<16x1568xbf16, #tpu.memory_space<vmem>>, vector<16x32xbf16>,
    %153 = vector.extract_strided_slice %11 {offsets = [47, 0, 0], sizes = [1, 16, 32], strides = [1, 1, 1]} : vector<49x16x32xbf16> to vector<1x16x32xbf16>
    %154 = vector.shape_cast %153 : vector<1x16x32xbf16> to vector<16x32xbf16>
    %c0_56 = arith.constant 0 : index
    %c1504 = arith.constant 1504 : index
    %155 = vector.load %arg17[%c0_56, %c1504] : memref<16x1568xbf16, #tpu.memory_space<vmem>>, vector<16x32xbf16>
    tpu.vector_store %arg17[%c0_56, %c1504], %154 {strides = array<i32>} : memref<16x1568xbf16, #tpu.memory_space<vmem>>, vector<16x32xbf16>,
    %156 = vector.extract_strided_slice %11 {offsets = [48, 0, 0], sizes = [1, 16, 32], strides = [1, 1, 1]} : vector<49x16x32xbf16> to vector<1x16x32xbf16>
    %157 = vector.shape_cast %156 : vector<1x16x32xbf16> to vector<16x32xbf16>
    %c0_57 = arith.constant 0 : index
    %c1536 = arith.constant 1536 : index
    %158 = vector.load %arg17[%c0_57, %c1536] : memref<16x1568xbf16, #tpu.memory_space<vmem>>, vector<16x32xbf16>
    tpu.vector_store %arg17[%c0_57, %c1536], %157 {strides = array<i32>} : memref<16x1568xbf16, #tpu.memory_space<vmem>>, vector<16x32xbf16>,
    %c0_58 = arith.constant 0 : index
    %c0_59 = arith.constant 0 : index
    %159 = vector.load %arg17[%c0_58, %c0_59] : memref<16x1568xbf16, #tpu.memory_space<vmem>>, vector<16x1568xbf16>
    %c0_60 = arith.constant 0 : index
    %c0_61 = arith.constant 0 : index
    %160 = vector.load %arg5[%c0_60, %c0_61] : memref<1568x128xbf16, #tpu.memory_space<vmem>>, vector<1568x128xbf16>
    %cst_62 = arith.constant dense<0.000000e+00> : vector<16x128xf32>
    %161 = tpu.matmul %159, %160, %cst_62 {dimension_numbers = #tpu.dot_dimension_numbers<[1], [0], [0], [1], [0, 0, 1, 1], [], []>} : vector<16x1568xbf16>, vector<1568x128xbf16>, vector<16x128xf32> -> vector<16x128xf32>
    %c0_63 = arith.constant 0 : index
    %c0_64 = arith.constant 0 : index
    %162 = vector.load %arg6[%c0_63, %c0_64] : memref<1x128xf32, #tpu.memory_space<vmem>>, vector<1x128xf32>
    %163 = vector.broadcast %162 : vector<1x128xf32> to vector<16x128xf32>
    %164 = arith.addf %161, %163 : vector<16x128xf32>
    %c0_65 = arith.constant 0 : index
    %c0_66 = arith.constant 0 : index
    %c0_67 = arith.constant 0 : index
    %165 = vector.load %arg16[%c0_65, %c0_66, %c0_67] : memref<1x16x128xf32, #tpu.memory_space<vmem>>, vector<1x16x128xf32>
    %166 = vector.shape_cast %165 : vector<1x16x128xf32> to vector<16x128xf32>
    %167 = vector.shape_cast %164 : vector<16x128xf32> to vector<1x16x128xf32>
    tpu.vector_store %arg16[%c0_65, %c0_66, %c0_67], %167 {strides = array<i32>} : memref<1x16x128xf32, #tpu.memory_space<vmem>>, vector<1x16x128xf32>,
    %c0_i32 = arith.constant 0 : i32
    %168 = arith.cmpi eq, %arg0, %c0_i32 : i32
    %169 = arith.extui %168 : i1 to i32
    %c0_i32_68 = arith.constant 0 : i32
    %170 = arith.cmpi ne, %169, %c0_i32_68 : i32
    scf.if %170 {
      %174 = arith.truncf %164 : vector<16x128xf32> to vector<16x128xbf16>
      %c0_71 = arith.constant 0 : index
      %c0_72 = arith.constant 0 : index
      %175 = vector.load %arg8[%c0_71, %c0_72] : memref<128x128xbf16, #tpu.memory_space<vmem>>, vector<128x128xbf16>
      %cst_73 = arith.constant dense<0.000000e+00> : vector<16x128xf32>
      %176 = tpu.matmul %174, %175, %cst_73 {dimension_numbers = #tpu.dot_dimension_numbers<[1], [0], [0], [1], [0, 0, 1, 1], [], []>} : vector<16x128xbf16>, vector<128x128xbf16>, vector<16x128xf32> -> vector<16x128xf32>
      %c0_74 = arith.constant 0 : index
      %c0_75 = arith.constant 0 : index
      %177 = vector.load %arg7[%c0_74, %c0_75] : memref<16x128xbf16, #tpu.memory_space<vmem>>, vector<16x128xbf16>
      %c0_76 = arith.constant 0 : index
      %c0_77 = arith.constant 0 : index
      %178 = vector.load %arg9[%c0_76, %c0_77] : memref<128x128xbf16, #tpu.memory_space<vmem>>, vector<128x128xbf16>
      %cst_78 = arith.constant dense<0.000000e+00> : vector<16x128xf32>
      %179 = tpu.matmul %177, %178, %cst_78 {dimension_numbers = #tpu.dot_dimension_numbers<[1], [0], [0], [1], [0, 0, 1, 1], [], []>} : vector<16x128xbf16>, vector<128x128xbf16>, vector<16x128xf32> -> vector<16x128xf32>
      %180 = arith.addf %176, %179 : vector<16x128xf32>
      %c0_79 = arith.constant 0 : index
      %c0_80 = arith.constant 0 : index
      %181 = vector.load %arg10[%c0_79, %c0_80] : memref<1x128xf32, #tpu.memory_space<vmem>>, vector<1x128xf32>
      %182 = vector.broadcast %181 : vector<1x128xf32> to vector<16x128xf32>
      %183 = arith.addf %180, %182 : vector<16x128xf32>
      %cst_81 = arith.constant 0.000000e+00 : f32
      %184 = vector.broadcast %cst_81 : f32 to vector<16x128xf32>
      %185 = arith.maximumf %183, %184 : vector<16x128xf32>
      %186 = arith.truncf %185 : vector<16x128xf32> to vector<16x128xbf16>
      %c0_82 = arith.constant 0 : index
      %c0_83 = arith.constant 0 : index
      %187 = vector.load %arg11[%c0_82, %c0_83] : memref<128x128xbf16, #tpu.memory_space<vmem>>, vector<128x128xbf16>
      %cst_84 = arith.constant dense<0.000000e+00> : vector<16x128xf32>
      %188 = tpu.matmul %186, %187, %cst_84 {dimension_numbers = #tpu.dot_dimension_numbers<[1], [0], [0], [1], [0, 0, 1, 1], [], []>} : vector<16x128xbf16>, vector<128x128xbf16>, vector<16x128xf32> -> vector<16x128xf32>
      %c0_85 = arith.constant 0 : index
      %c0_86 = arith.constant 0 : index
      %189 = vector.load %arg12[%c0_85, %c0_86] : memref<1x128xf32, #tpu.memory_space<vmem>>, vector<1x128xf32>
      %190 = vector.broadcast %189 : vector<1x128xf32> to vector<16x128xf32>
      %191 = arith.addf %188, %190 : vector<16x128xf32>
      %cst_87 = arith.constant 0.000000e+00 : f32
      %192 = vector.broadcast %cst_87 : f32 to vector<16x128xf32>
      %193 = arith.maximumf %191, %192 : vector<16x128xf32>
      %194 = arith.truncf %193 : vector<16x128xf32> to vector<16x128xbf16>
      %c0_88 = arith.constant 0 : index
      %c0_89 = arith.constant 0 : index
      %195 = vector.load %arg13[%c0_88, %c0_89] : memref<128x128xbf16, #tpu.memory_space<vmem>>, vector<128x128xbf16>
      %cst_90 = arith.constant dense<0.000000e+00> : vector<16x128xf32>
      %196 = tpu.matmul %194, %195, %cst_90 {dimension_numbers = #tpu.dot_dimension_numbers<[1], [0], [0], [1], [0, 0, 1, 1], [], []>} : vector<16x128xbf16>, vector<128x128xbf16>, vector<16x128xf32> -> vector<16x128xf32>
      %c0_91 = arith.constant 0 : index
      %c0_92 = arith.constant 0 : index
      %197 = vector.load %arg14[%c0_91, %c0_92] : memref<1x128xf32, #tpu.memory_space<vmem>>, vector<1x128xf32>
      %198 = vector.broadcast %197 : vector<1x128xf32> to vector<16x128xf32>
      %199 = arith.addf %196, %198 : vector<16x128xf32>
      %c0_93 = arith.constant 0 : index
      %c0_94 = arith.constant 0 : index
      %c0_95 = arith.constant 0 : index
      %200 = vector.load %arg15[%c0_93, %c0_94, %c0_95] : memref<1x16x128xf32, #tpu.memory_space<vmem>>, vector<1x16x128xf32>
      %201 = vector.shape_cast %200 : vector<1x16x128xf32> to vector<16x128xf32>
      %202 = vector.shape_cast %199 : vector<16x128xf32> to vector<1x16x128xf32>
      tpu.vector_store %arg15[%c0_93, %c0_94, %c0_95], %202 {strides = array<i32>} : memref<1x16x128xf32, #tpu.memory_space<vmem>>, vector<1x16x128xf32>,
    } else {
    }
    %c0_i32_69 = arith.constant 0 : i32
    %171 = arith.cmpi ne, %arg0, %c0_i32_69 : i32
    %172 = arith.extui %171 : i1 to i32
    %c0_i32_70 = arith.constant 0 : i32
    %173 = arith.cmpi ne, %172, %c0_i32_70 : i32
    scf.if %173 {
      %cst_71 = arith.constant 0.000000e+00 : f32
      %174 = vector.broadcast %cst_71 : f32 to vector<16x128xf32>
      %c0_72 = arith.constant 0 : index
      %c0_73 = arith.constant 0 : index
      %c0_74 = arith.constant 0 : index
      %175 = vector.load %arg15[%c0_72, %c0_73, %c0_74] : memref<1x16x128xf32, #tpu.memory_space<vmem>>, vector<1x16x128xf32>
      %176 = vector.shape_cast %175 : vector<1x16x128xf32> to vector<16x128xf32>
      %177 = vector.shape_cast %174 : vector<16x128xf32> to vector<1x16x128xf32>
      tpu.vector_store %arg15[%c0_72, %c0_73, %c0_74], %177 {strides = array<i32>} : memref<1x16x128xf32, #tpu.memory_space<vmem>>, vector<1x16x128xf32>,
    } else {
    }
    return
  }
  func.func @transform_0(%arg0: i32, %arg1: i32) -> (i32, i32, i32, i32) {
    %c0_i32 = arith.constant 0 : i32
    %c0_i32_0 = arith.constant 0 : i32
    %c0_i32_1 = arith.constant 0 : i32
    return %arg0, %c0_i32, %arg1, %c0_i32_0 : i32, i32, i32, i32
  }
  func.func @transform_1(%arg0: i32, %arg1: i32) -> (i32, i32) {
    %c0_i32 = arith.constant 0 : i32
    %c0_i32_0 = arith.constant 0 : i32
    %c0_i32_1 = arith.constant 0 : i32
    return %c0_i32, %c0_i32_0 : i32, i32
  }
  func.func @transform_2(%arg0: i32, %arg1: i32) -> (i32, i32) {
    %c0_i32 = arith.constant 0 : i32
    %c0_i32_0 = arith.constant 0 : i32
    %c0_i32_1 = arith.constant 0 : i32
    return %c0_i32, %c0_i32_0 : i32, i32
  }
  func.func @transform_3(%arg0: i32, %arg1: i32) -> (i32, i32) {
    %c0_i32 = arith.constant 0 : i32
    %c0_i32_0 = arith.constant 0 : i32
    %c0_i32_1 = arith.constant 0 : i32
    return %c0_i32, %c0_i32_0 : i32, i32
  }
  func.func @transform_4(%arg0: i32, %arg1: i32) -> (i32, i32) {
    %c0_i32 = arith.constant 0 : i32
    %c0_i32_0 = arith.constant 0 : i32
    %c0_i32_1 = arith.constant 0 : i32
    return %c0_i32, %c0_i32_0 : i32, i32
  }
  func.func @transform_5(%arg0: i32, %arg1: i32) -> (i32, i32) {
    %c0_i32 = arith.constant 0 : i32
    %c0_i32_0 = arith.constant 0 : i32
    return %arg1, %c0_i32 : i32, i32
  }
  func.func @transform_6(%arg0: i32, %arg1: i32) -> (i32, i32) {
    %c0_i32 = arith.constant 0 : i32
    %c0_i32_0 = arith.constant 0 : i32
    %c0_i32_1 = arith.constant 0 : i32
    return %c0_i32, %c0_i32_0 : i32, i32
  }
  func.func @transform_7(%arg0: i32, %arg1: i32) -> (i32, i32) {
    %c0_i32 = arith.constant 0 : i32
    %c0_i32_0 = arith.constant 0 : i32
    %c0_i32_1 = arith.constant 0 : i32
    return %c0_i32, %c0_i32_0 : i32, i32
  }
  func.func @transform_8(%arg0: i32, %arg1: i32) -> (i32, i32) {
    %c0_i32 = arith.constant 0 : i32
    %c0_i32_0 = arith.constant 0 : i32
    %c0_i32_1 = arith.constant 0 : i32
    return %c0_i32, %c0_i32_0 : i32, i32
  }
  func.func @transform_9(%arg0: i32, %arg1: i32) -> (i32, i32) {
    %c0_i32 = arith.constant 0 : i32
    %c0_i32_0 = arith.constant 0 : i32
    %c0_i32_1 = arith.constant 0 : i32
    return %c0_i32, %c0_i32_0 : i32, i32
  }
  func.func @transform_10(%arg0: i32, %arg1: i32) -> (i32, i32) {
    %c0_i32 = arith.constant 0 : i32
    %c0_i32_0 = arith.constant 0 : i32
    %c0_i32_1 = arith.constant 0 : i32
    return %c0_i32, %c0_i32_0 : i32, i32
  }
  func.func @transform_11(%arg0: i32, %arg1: i32) -> (i32, i32) {
    %c0_i32 = arith.constant 0 : i32
    %c0_i32_0 = arith.constant 0 : i32
    %c0_i32_1 = arith.constant 0 : i32
    return %c0_i32, %c0_i32_0 : i32, i32
  }
  func.func @transform_12(%arg0: i32, %arg1: i32) -> (i32, i32) {
    %c0_i32 = arith.constant 0 : i32
    %c0_i32_0 = arith.constant 0 : i32
    %c0_i32_1 = arith.constant 0 : i32
    return %c0_i32, %c0_i32_0 : i32, i32
  }
  func.func @transform_13(%arg0: i32, %arg1: i32) -> (i32, i32, i32) {
    %c0_i32 = arith.constant 0 : i32
    %c0_i32_0 = arith.constant 0 : i32
    return %arg0, %arg1, %c0_i32 : i32, i32, i32
  }
  func.func @transform_14(%arg0: i32, %arg1: i32) -> (i32, i32, i32) {
    %c0_i32 = arith.constant 0 : i32
    %c0_i32_0 = arith.constant 0 : i32
    return %arg0, %arg1, %c0_i32 : i32, i32, i32
  }
}

</mosaic_0001>

<bundles_post_ra>
// kernel: forward_dynamic_predictor.1
= control target key start
LH: loop header
LB: loop body
LE: loop exit
PB: predicated region body
PF: predicated region fallthrough
CT: control target
= control target key end

     0   :  { %s4667_s29 = smov 0   ;;  %s4669_s30 = smov 0   ;;  %s5572_s0 = inlined_call_operand.vmem [shape: bf16[2,49,16,48], index: 0, kind: input, shape index: {}]   ;;  %s5573_s1 = inlined_call_operand.vmem [shape: bf16[48,32], index: 1, kind: input, shape index: {}]   ;;  %s5574_s2 = inlined_call_operand.vmem [shape: f32[1,32], index: 2, kind: input, shape index: {}]   ;;  %s5575_s3 = inlined_call_operand.vmem [shape: bf16[1568,128], index: 3, kind: input, shape index: {}]   ;;  %s5576_s4 = inlined_call_operand.vmem [shape: f32[1,128], index: 4, kind: input, shape index: {}]   ;;  %s5577_s5 = inlined_call_operand.vmem [shape: bf16[16,128], index: 5, kind: input, shape index: {}]   ;;  %s5578_s6 = inlined_call_operand.vmem [shape: bf16[128,128], index: 6, kind: input, shape index: {}]   ;;  %s5579_s7 = inlined_call_operand.vmem [shape: bf16[128,128], index: 7, kind: input, shape index: {}]   ;;  %s5580_s8 = inlined_call_operand.vmem [shape: f32[1,128], index: 8, kind: input, shape index: {}]   ;;  %s5581_s9 = inlined_call_operand.vmem [shape: bf16[128,128], index: 9, kind: input, shape index: {}]   ;;  %s5582_s10 = inlined_call_operand.vmem [shape: f32[1,128], index: 10, kind: input, shape index: {}]   ;;  %s5583_s11 = inlined_call_operand.vmem [shape: bf16[128,128], index: 11, kind: input, shape index: {}]   ;;  %s5584_s12 = inlined_call_operand.vmem [shape: f32[1,128], index: 12, kind: input, shape index: {}]   ;;  %s5585_s13 = inlined_call_operand.vmem [shape: f32[2,16,128], index: 13, kind: output, shape index: {0}]   ;;  %s5586_s14 = inlined_call_operand.vmem [shape: f32[2,16,128], index: 14, kind: output, shape index: {1}]  }
   0x1   :  { %s4671_s15 = smov 0  }
   0x2 LB: > { %s37_s16 = sadd.s32 1, %s4582_s30  ;;  %p3478_p0 = scmp.ge.s32.totalorder %s4586_s15, 1  ;;  %s4586_s15 = sphi %s4671_s15, %s25_s15   ;;  %s4582_s30 = sphi %s4669_s30, %s5588_s30   ;;  %s4578_s29 = sphi %s4667_s29, %s5587_s29  }
   0x3   : > { %p39_p1 = scmp.ge.s32.totalorder %s37_s16, 2  ;;  %p449_p2 = scmp.lt.s32.totalorder %s4586_s15, 3 }
   0x5   : > { %s5590_s16 = smov (%p39_p1, %s37_s16), 0  ;;  %p450_p3 = pnand %p3478_p0, %p449_p2 }
   0x6   : > { %p518_p4 = scmp.lt.s32.totalorder (!%p450_p3), %s4578_s29, 1  ;;  %s4588_s18 = smov (!%p450_p3), 96  }
   0x7   : > { %453 = sbr.rel (%p450_p3) target bundleno = 1239 (0x4d7), region = 72  ;;  %s4589_s19 = smov (!%p450_p3), 64  }
   0x8   : > { %s4590_s20 = smov (!%p450_p3), 32   ;;  %p4186_p5 = scmp.ne.s32.totalorder (!%p450_p3), %s4578_s29, 0 }
   0xc   : > { %v4375_v0 = vld [vmem:[%s5573_s1 + $0x10] sm:$0xff]  ;;  %v4374_v1 = vld [vmem:[%s5573_s1 + $0x8] sm:$0xff]  ;;  %s4695_s21 = scalar_select %p518_p4, %s4578_s29, 1  ;;  %v4373_v2 = vld [vmem:[%s5573_s1] sm:$0xff]  ;;  %vm925_vm0 = vcmask 392192   ;;  %vm1523_vm1 = vcmask 257024  }
   0xd   : > { %1078 = vmatpush.bf16.msra.mxu0 %v4375_v0  ;;  %4520 = vmatpush.bf16.msra.mxu1 %v4375_v0  ;;  %v4757_v27 = vld [vmem:[%s5574_s2] ss:$0 sm:$0xff]  ;;  %vm1534_vm2 = vcmask 519424   ;;  %vm1545_vm3 = vcmask 781824   ;;  %vm1556_vm4 = vcmask 1044224   ;;  %vm2780_vm5 = vcmask 261120  }
   0xe   : > { %4521 = vmatpush.bf16.msra.mxu2 %v4375_v0  ;;  %4522 = vmatpush.bf16.msra.mxu3 %v4375_v0  ;;  %s4529_s22 = smul.u32 392, %s4695_s21 }
  0x10   : > { %s4704_s27 = scalar_lea.vmem %s5572_s0, %s4529_s22 }
  0x11   : > { %1079 = vmatpush.bf16.msra.mxu0 %v4374_v1  ;;  %4523 = vmatpush.bf16.msra.mxu1 %v4374_v1  ;;  %v4324_v3 = vld [vmem:[%s4704_s27] sm:$0xff]  ;;  %v4343_v4 = vld [vmem:[%s4704_s27 + $0x98] sm:$0xff]  ;;  %v4350_v5 = vld [vmem:[%s4704_s27 + $0xd0] sm:$0xff] }
  0x12   : > { %4524 = vmatpush.bf16.msra.mxu2 %v4374_v1  ;;  %4525 = vmatpush.bf16.msra.mxu3 %v4374_v1  ;;  %v4362_v6 = vld [vmem:[%s4704_s27 + $0x130] sm:$0xff]  ;;  %v4325_v7 = vld [vmem:[%s4704_s27 + $0x8] sm:$0xff]  ;;  %v4344_v8 = vld [vmem:[%s4704_s27 + $0xa0] sm:$0xff] }
  0x13   : > { %v4351_v9 = vld [vmem:[%s4704_s27 + $0xd8] sm:$0xff]  ;;  %v4326_v10 = vld [vmem:[%s4704_s27 + $0x10] sm:$0xff]  ;;  %v4345_v11 = vld [vmem:[%s4704_s27 + $0xa8] sm:$0xff] }
  0x14   : > { %v4352_v12 = vld [vmem:[%s4704_s27 + $0xe0] sm:$0xff]  ;;  %v4327_v13 = vld [vmem:[%s4704_s27 + $0x18] sm:$0xff]  ;;  %v4346_v14 = vld [vmem:[%s4704_s27 + $0xb0] sm:$0xff] }
  0x15   : > { %1080 = vmatpush.bf16.msra.mxu0 %v4373_v2  ;;  %4526 = vmatpush.bf16.msra.mxu1 %v4373_v2  ;;  %v4353_v15 = vld [vmem:[%s4704_s27 + $0xe8] sm:$0xff]  ;;  %v4328_v16 = vld [vmem:[%s4704_s27 + $0x20] sm:$0xff]  ;;  %v4347_v17 = vld [vmem:[%s4704_s27 + $0xb8] sm:$0xff] }
  0x16   : > { %4527 = vmatpush.bf16.msra.mxu2 %v4373_v2  ;;  %4528 = vmatpush.bf16.msra.mxu3 %v4373_v2  ;;  %v4354_v18 = vld [vmem:[%s4704_s27 + $0xf0] sm:$0xff]  ;;  %v4329_v19 = vld [vmem:[%s4704_s27 + $0x28] sm:$0xff]  ;;  %v4348_v20 = vld [vmem:[%s4704_s27 + $0xc0] sm:$0xff] }
  0x17   : > { %v4355_v21 = vld [vmem:[%s4704_s27 + $0xf8] sm:$0xff]  ;;  %v4330_v22 = vld [vmem:[%s4704_s27 + $0x30] sm:$0xff]  ;;  %v4349_v23 = vld [vmem:[%s4704_s27 + $0xc8] sm:$0xff] }
  0x18   : > { %3692 = vmatmul.msk.bf16.vlgmr.msra.gmra.mxu0 %vm925_vm0, %v4324_v3  ;;  %3711 = vmatmul.msk.bf16.vlgmr.msra.gmra.mxu1 %vm925_vm0, %v4343_v4  ;;  %v4356_v24 = vld [vmem:[%s4704_s27 + $0x100] sm:$0xff]  ;;  %v4331_v25 = vld [vmem:[%s4704_s27 + $0x38] sm:$0xff]  ;;  %v4357_v26 = vld [vmem:[%s4704_s27 + $0x108] sm:$0xff] }
  0x19   : > { %3718 = vmatmul.msk.bf16.vlgmr.msra.gmra.mxu2 %vm925_vm0, %v4350_v5  ;;  %3730 = vmatmul.msk.bf16.vlgmr.msra.gmra.mxu3 %vm925_vm0, %v4362_v6  ;;  %v4332_v28 = vld [vmem:[%s4704_s27 + $0x40] sm:$0xff]  ;;  %v4358_v31 = vld [vmem:[%s4704_s27 + $0x110] sm:$0xff]  ;;  %v4333_v51 = vld [vmem:[%s4704_s27 + $0x48] sm:$0xff] }
  0x1a   : > { %v4359_v55 = vld [vmem:[%s4704_s27 + $0x118] sm:$0xff] }
  0x28   : > { %3693 = vmatmul.msk.bf16.gmra.mxu0 %vm925_vm0, %v4325_v7  ;;  %3712 = vmatmul.msk.bf16.gmra.mxu1 %vm925_vm0, %v4344_v8 }
  0x29   : > { %3719 = vmatmul.msk.bf16.gmra.mxu2 %vm925_vm0, %v4351_v9 }
  0x38   : > { %3694 = vmatmul.msk.bf16.gmra.mxu0 %vm925_vm0, %v4326_v10  ;;  %3713 = vmatmul.msk.bf16.gmra.mxu1 %vm925_vm0, %v4345_v11 }
  0x39   : > { %3720 = vmatmul.msk.bf16.gmra.mxu2 %vm925_vm0, %v4352_v12 }
  0x48   : > { %3695 = vmatmul.msk.bf16.gmra.mxu0 %vm925_vm0, %v4327_v13  ;;  %3714 = vmatmul.msk.bf16.gmra.mxu1 %vm925_vm0, %v4346_v14 }
  0x49   : > { %3721 = vmatmul.msk.bf16.gmra.mxu2 %vm925_vm0, %v4353_v15  ;;  %v4334_v15 = vld [vmem:[%s4704_s27 + $0x50] sm:$0xff] }
  0x58   : > { %3696 = vmatmul.msk.bf16.gmra.mxu0 %vm925_vm0, %v4328_v16  ;;  %3715 = vmatmul.msk.bf16.gmra.mxu1 %vm925_vm0, %v4347_v17 }
  0x59   : > { %3722 = vmatmul.msk.bf16.gmra.mxu2 %vm925_vm0, %v4354_v18 }
  0x68   : > { %3697 = vmatmul.msk.bf16.gmra.mxu0 %vm925_vm0, %v4329_v19  ;;  %3716 = vmatmul.msk.bf16.gmra.mxu1 %vm925_vm0, %v4348_v20  ;;  %v4360_v20 = vld [vmem:[%s4704_s27 + $0x120] sm:$0xff] }
  0x69   : > { %3723 = vmatmul.msk.bf16.gmra.mxu2 %vm925_vm0, %v4355_v21 }
  0x78   : > { %3698 = vmatmul.msk.bf16.gmra.mxu0 %vm925_vm0, %v4330_v22  ;;  %3717 = vmatmul.msk.bf16.gmra.mxu1 %vm925_vm0, %v4349_v23 }
  0x79   : > { %3724 = vmatmul.msk.bf16.gmra.mxu2 %vm925_vm0, %v4356_v24 }
  0x88   : > { %3699 = vmatmul.msk.bf16.gmra.mxu0 %vm925_vm0, %v4331_v25 }
  0x89   : > { %3725 = vmatmul.msk.bf16.gmra.mxu2 %vm925_vm0, %v4357_v26 }
  0x95   : > { %v1082_v29 = vpop.f32.mrf.mxu0  ;;  %v1177_v30 = vpop.f32.mrf.mxu1 }
  0x96   : > { %v1083_v32 = vadd.f32 %v4757_v27, %v1082_v29  ;;  %v1178_v33 = vadd.f32 %v4757_v27, %v1177_v30  ;;  %v4363_v29 = vld [vmem:[%s4704_s27 + $0x138] sm:$0xff] }
  0x97   : > { %3731 = vmatmul.msk.bf16.gmra.mxu3 %vm925_vm0, %v4363_v29 }
  0x98   : > { %v1327_v34 = vmax.f32 %v1083_v32, 0.0  ;;  %v1365_v35 = vmax.f32 %v1178_v33, 0.0  ;;  %3700 = vmatmul.msk.bf16.gmra.mxu0 %vm925_vm0, %v4332_v28 }
  0x99   : > { %3726 = vmatmul.msk.bf16.gmra.mxu2 %vm925_vm0, %v4358_v31 }
  0x9a   : > { %v1425_v36 = vpack.c.bf16 %v1327_v34, %v1327_v34  ;;  %v1463_v37 = vpack.c.bf16 %v1365_v35, %v1365_v35 }
  0x9c   : > { %1524 = vst.msk [vmem:[#allocation2] sm:$0xf] %vm1523_vm1, %v1425_v36  ;;  %v1212_v38 = vpop.f32.mrf.mxu2  ;;  %1679 = vrot.lane.b32.xlu1 %v1463_v37, %s4588_s18  ;;  %v1272_v39 = vpop.f32.mrf.mxu3 }
  0x9d   : > { %v1213_v40 = vadd.f32 %v4757_v27, %v1212_v38  ;;  %v1084_v41 = vpop.f32.mrf.mxu0  ;;  %v1179_v42 = vpop.f32.mrf.mxu1  ;;  %v1273_v45 = vadd.f32 %v4757_v27, %v1272_v39 }
  0x9e   : > { %v1085_v43 = vadd.f32 %v4757_v27, %v1084_v41  ;;  %v1180_v59 = vadd.f32 %v4757_v27, %v1179_v42 }
  0x9f   : > { %v1379_v44 = vmax.f32 %v1213_v40, 0.0  ;;  %v1403_v49 = vmax.f32 %v1273_v45, 0.0 }
  0xa0   : > { %v1328_v46 = vmax.f32 %v1085_v43, 0.0  ;;  %v1366_v0 = vmax.f32 %v1180_v59, 0.0 }
  0xa1   : > { %v1477_v47 = vpack.c.bf16 %v1379_v44, %v1379_v44  ;;  %v1501_v58 = vpack.c.bf16 %v1403_v49, %v1403_v49  ;;  %v4335_v44 = vld [vmem:[%s4704_s27 + $0x58] sm:$0xff] }
  0xa2   : > { %v1426_v48 = vpack.c.bf16 %v1328_v46, %v1328_v46  ;;  %v1464_v8 = vpack.c.bf16 %v1366_v0, %v1366_v0 }
  0xa3   : > { %1733 = vrot.lane.b32.xlu2 %v1477_v47, %s4589_s19 }
  0xa4   : > { %1525 = vst.msk [vmem:[#allocation2 + $0x34] sm:$0xf] %vm1523_vm1, %v1426_v48  ;;  %v1214_v50 = vpop.f32.mrf.mxu2  ;;  %v4361_v48 = vld [vmem:[%s4704_s27 + $0x128] sm:$0xff] }
  0xa5   : > { %v1215_v52 = vadd.f32 %v4757_v27, %v1214_v50  ;;  %v1087_v53 = vpop.f32.mrf.mxu0  ;;  %v1182_v54 = vpop.f32.mrf.mxu1 }
  0xa6   : > { %v1183_v56 = vadd.f32 %v4757_v27, %v1182_v54  ;;  %v1088_v61 = vadd.f32 %v4757_v27, %v1087_v53 }
  0xa7   : > { %v1380_v57 = vmax.f32 %v1215_v52, 0.0 }
  0xa8   : > { %v1367_v60 = vmax.f32 %v1183_v56, 0.0  ;;  %3701 = vmatmul.msk.bf16.gmra.mxu0 %vm925_vm0, %v4333_v51  ;;  %v1329_v2 = vmax.f32 %v1088_v61, 0.0  ;;  %v4364_v56 = vld [vmem:[%s4704_s27 + $0x140] sm:$0xff] }
  0xa9   : > { %3727 = vmatmul.msk.bf16.gmra.mxu2 %vm925_vm0, %v4359_v55  ;;  %v1478_v62 = vpack.c.bf16 %v1380_v57, %v1380_v57  ;;  %3732 = vmatmul.msk.bf16.gmra.mxu3 %vm925_vm0, %v4364_v56 }
  0xaa   : > { %v1465_v63 = vpack.c.bf16 %v1367_v60, %v1367_v60  ;;  %v1427_v10 = vpack.c.bf16 %v1329_v2, %v1329_v2 }
  0xab   : > { %1735 = vrot.lane.b32.xlu0 %v1478_v62, %s4589_s19  ;;  %1829 = vrot.lane.b32.xlu2 %v1501_v58, %s4589_s19 }
  0xac   : > { %1687 = vst.msk [vmem:[#allocation2 + $0x14] sm:$0xf] %vm1523_vm1, %v1465_v63  ;;  %v1217_v1 = vpop.f32.mrf.mxu2 }
  0xad   : > { %v1218_v3 = vadd.f32 %v4757_v27, %v1217_v1  ;;  %v1089_v4 = vpop.f32.mrf.mxu0  ;;  %v1184_v5 = vpop.f32.mrf.mxu1 }
  0xae   : > { %v1185_v6 = vadd.f32 %v4757_v27, %v1184_v5  ;;  %v1090_v12 = vadd.f32 %v4757_v27, %v1089_v4  ;;  %v4336_v5 = vld [vmem:[%s4704_s27 + $0x60] sm:$0xff] }
  0xaf   : > { %v1381_v7 = vmax.f32 %v1218_v3, 0.0 }
  0xb0   : > { %v1368_v9 = vmax.f32 %v1185_v6, 0.0  ;;  %v1330_v16 = vmax.f32 %v1090_v12, 0.0 }
  0xb1   : > { %v1479_v11 = vpack.c.bf16 %v1381_v7, %v1381_v7 }
  0xb2   : > { %v1466_v13 = vpack.c.bf16 %v1368_v9, %v1368_v9  ;;  %v1428_v25 = vpack.c.bf16 %v1330_v16, %v1330_v16 }
  0xb3   : > { %1528 = vrot.lane.b32.xlu0 %v1427_v10, %s4590_s20  ;;  %1743 = vrot.lane.b32.xlu1 %v1479_v11, %s4588_s18 }
  0xb4   : > { %1688 = vst.msk [vmem:[#allocation2 + $0x48] sm:$0xf] %vm1523_vm1, %v1466_v13  ;;  %v1219_v14 = vpop.f32.mrf.mxu2  ;;  %1681 = vrot.lane.b32.xlu2 %v1464_v8, %s4588_s18 }
  0xb5   : > { %v1220_v17 = vadd.f32 %v4757_v27, %v1219_v14  ;;  %v1092_v18 = vpop.f32.mrf.mxu0  ;;  %v1187_v19 = vpop.f32.mrf.mxu1 }
  0xb6   : > { %v1093_v21 = vadd.f32 %v4757_v27, %v1092_v18  ;;  %v1188_v23 = vadd.f32 %v4757_v27, %v1187_v19  ;;  %v4365_v18 = vld [vmem:[%s4704_s27 + $0x148] sm:$0xff] }
  0xb7   : > { %v1382_v22 = vmax.f32 %v1220_v17, 0.0 }
  0xb8   : > { %v1331_v24 = vmax.f32 %v1093_v21, 0.0  ;;  %3702 = vmatmul.msk.bf16.gmra.mxu0 %vm925_vm0, %v4334_v15  ;;  %v1369_v30 = vmax.f32 %v1188_v23, 0.0 }
  0xb9   : > { %v1480_v26 = vpack.c.bf16 %v1382_v22, %v1382_v22  ;;  %3728 = vmatmul.msk.bf16.gmra.mxu2 %vm925_vm0, %v4360_v20  ;;  %3733 = vmatmul.msk.bf16.gmra.mxu3 %vm925_vm0, %v4365_v18 }
  0xba   : > { %v1429_v28 = vpack.c.bf16 %v1331_v24, %v1331_v24  ;;  %v1467_v36 = vpack.c.bf16 %v1369_v30, %v1369_v30 }
  0xbb   : > { %1530 = vrot.lane.b32.xlu0 %v1428_v25, %s4590_s20 }
  0xbc   : > { %v1222_v31 = vpop.f32.mrf.mxu2  ;;  %1539 = vrot.lane.b32.xlu1 %v1429_v28, %s4589_s19  ;;  %1745 = vrot.lane.b32.xlu2 %v1480_v26, %s4588_s18 }
  0xbd   : > { %v1223_v32 = vadd.f32 %v4757_v27, %v1222_v31  ;;  %v1094_v33 = vpop.f32.mrf.mxu0  ;;  %v1189_v34 = vpop.f32.mrf.mxu1 }
  0xbe   : > { %v1095_v35 = vadd.f32 %v4757_v27, %v1094_v33  ;;  %v1190_v39 = vadd.f32 %v4757_v27, %v1189_v34  ;;  %v4337_v34 = vld [vmem:[%s4704_s27 + $0x68] sm:$0xff] }
  0xbf   : > { %v1383_v37 = vmax.f32 %v1223_v32, 0.0 }
  0xc0   : > { %v1332_v38 = vmax.f32 %v1095_v35, 0.0  ;;  %v1370_v42 = vmax.f32 %v1190_v39, 0.0 }
  0xc1   : > { %v1481_v40 = vpack.c.bf16 %v1383_v37, %v1383_v37 }
  0xc2   : > { %v1430_v41 = vpack.c.bf16 %v1332_v38, %v1332_v38  ;;  %v1468_v51 = vpack.c.bf16 %v1370_v42, %v1370_v42 }
  0xc3   : > { %1751 = vst.msk [vmem:[#allocation2 + $0x1c] sm:$0xf] %vm1523_vm1, %v1481_v40  ;;  %1691 = vrot.lane.b32.xlu0 %v1467_v36, %s4590_s20 }
  0xc4   : > { %v1224_v43 = vpop.f32.mrf.mxu2  ;;  %1541 = vrot.lane.b32.xlu1 %v1430_v41, %s4589_s19 }
  0xc5   : > { %v1225_v45 = vadd.f32 %v4757_v27, %v1224_v43  ;;  %v1097_v46 = vpop.f32.mrf.mxu0  ;;  %v1192_v47 = vpop.f32.mrf.mxu1 }
  0xc6   : > { %v1098_v49 = vadd.f32 %v4757_v27, %v1097_v46  ;;  %v1193_v53 = vadd.f32 %v4757_v27, %v1192_v47 }
  0xc7   : > { %v1384_v50 = vmax.f32 %v1225_v45, 0.0  ;;  %v4366_v45 = vld [vmem:[%s4704_s27 + $0x150] sm:$0xff] }
  0xc8   : > { %v1333_v52 = vmax.f32 %v1098_v49, 0.0  ;;  %3703 = vmatmul.msk.bf16.gmra.mxu0 %vm925_vm0, %v4335_v44  ;;  %v1371_v57 = vmax.f32 %v1193_v53, 0.0 }
  0xc9   : > { %v1482_v54 = vpack.c.bf16 %v1384_v50, %v1384_v50  ;;  %3729 = vmatmul.msk.bf16.gmra.mxu2 %vm925_vm0, %v4361_v48  ;;  %3734 = vmatmul.msk.bf16.gmra.mxu3 %vm925_vm0, %v4366_v45 }
  0xca   : > { %v1431_v55 = vpack.c.bf16 %v1333_v52, %v1333_v52  ;;  %v1469_v0 = vpack.c.bf16 %v1371_v57, %v1371_v57 }
  0xcb   : > { %1752 = vst.msk [vmem:[#allocation2 + $0x50] sm:$0xf] %vm1523_vm1, %v1482_v54 }
  0xcc   : > { %v1227_v58 = vpop.f32.mrf.mxu2  ;;  %1550 = vrot.lane.b32.xlu2 %v1431_v55, %s4588_s18  ;;  %1693 = vrot.lane.b32.xlu1 %v1468_v51, %s4590_s20 }
  0xcd   : > { %v1228_v59 = vadd.f32 %v4757_v27, %v1227_v58  ;;  %v1099_v60 = vpop.f32.mrf.mxu0  ;;  %v1194_v61 = vpop.f32.mrf.mxu1 }
  0xce   : > { %v1195_v63 = vadd.f32 %v4757_v27, %v1194_v61  ;;  %v1100_v2 = vadd.f32 %v4757_v27, %v1099_v60 }
  0xcf   : > { %v1385_v62 = vmax.f32 %v1228_v59, 0.0  ;;  %v4338_v59 = vld [vmem:[%s4704_s27 + $0x70] sm:$0xff] }
  0xd0   : > { %v1372_v3 = vmax.f32 %v1195_v63, 0.0  ;;  %v1334_v9 = vmax.f32 %v1100_v2, 0.0 }
  0xd1   : > { %v1483_v1 = vpack.c.bf16 %v1385_v62, %v1385_v62 }
  0xd2   : > { %v1470_v11 = vpack.c.bf16 %v1372_v3, %v1372_v3  ;;  %v1432_v16 = vpack.c.bf16 %v1334_v9, %v1334_v9 }
  0xd3   : > { %1755 = vrot.lane.b32.xlu0 %v1483_v1, %s4590_s20 }
  0xd4   : > { %v1229_v4 = vpop.f32.mrf.mxu2  ;;  %1701 = vrot.lane.b32.xlu2 %v1469_v0, %s4589_s19 }
  0xd5   : > { %v1230_v6 = vadd.f32 %v4757_v27, %v1229_v4  ;;  %v1102_v7 = vpop.f32.mrf.mxu0  ;;  %v1197_v8 = vpop.f32.mrf.mxu1 }
  0xd6   : > { %v1103_v10 = vadd.f32 %v4757_v27, %v1102_v7  ;;  %v1198_v13 = vadd.f32 %v4757_v27, %v1197_v8  ;;  %v4367_v7 = vld [vmem:[%s4704_s27 + $0x158] sm:$0xff] }
  0xd7   : > { %v1386_v12 = vmax.f32 %v1230_v6, 0.0 }
  0xd8   : > { %v1335_v14 = vmax.f32 %v1103_v10, 0.0  ;;  %3704 = vmatmul.msk.bf16.gmra.mxu0 %vm925_vm0, %v4336_v5  ;;  %v1373_v19 = vmax.f32 %v1198_v13, 0.0 }
  0xd9   : > { %v1484_v15 = vpack.c.bf16 %v1386_v12, %v1386_v12  ;;  %3735 = vmatmul.msk.bf16.gmra.mxu3 %vm925_vm0, %v4367_v7 }
  0xda   : > { %v1433_v17 = vpack.c.bf16 %v1335_v14, %v1335_v14  ;;  %v1471_v25 = vpack.c.bf16 %v1373_v19, %v1373_v19 }
  0xdb   : > { %1757 = vrot.lane.b32.xlu1 %v1484_v15, %s4590_s20  ;;  %1703 = vrot.lane.b32.xlu0 %v1470_v11, %s4589_s19 }
  0xdc   : > { %1559 = vst.msk [vmem:[#allocation2 + $0x4] sm:$0xf] %vm1523_vm1, %v1433_v17  ;;  %v1232_v20 = vpop.f32.mrf.mxu2  ;;  %1552 = vrot.lane.b32.xlu2 %v1432_v16, %s4588_s18 }
  0xdd   : > { %v1233_v21 = vadd.f32 %v4757_v27, %v1232_v20  ;;  %v1104_v22 = vpop.f32.mrf.mxu0  ;;  %v1199_v23 = vpop.f32.mrf.mxu1 }
  0xde   : > { %v1105_v24 = vadd.f32 %v4757_v27, %v1104_v22  ;;  %v1200_v29 = vadd.f32 %v4757_v27, %v1199_v23  ;;  %v4396_v23 = vld [vmem:[%s5575_s3 + $0x38] sm:$0xff] }
  0xdf   : > { %v1387_v26 = vmax.f32 %v1233_v21, 0.0  ;;  %2784 = vmatpush.bf16.msrb.mxu1 %v4396_v23 }
  0xe0   : > { %v1336_v28 = vmax.f32 %v1105_v24, 0.0  ;;  %v1374_v32 = vmax.f32 %v1200_v29, 0.0 }
  0xe1   : > { %v1485_v30 = vpack.c.bf16 %v1387_v26, %v1387_v26 }
  0xe2   : > { %v1434_v31 = vpack.c.bf16 %v1336_v28, %v1336_v28  ;;  %v1472_v40 = vpack.c.bf16 %v1374_v32, %v1374_v32 }
  0xe3   : > { %1711 = vrot.lane.b32.xlu1 %v1471_v25, %s4588_s18  ;;  %v4339_v25 = vld [vmem:[%s4704_s27 + $0x78] sm:$0xff] }
  0xe4   : > { %1560 = vst.msk [vmem:[#allocation2 + $0x38] sm:$0xf] %vm1523_vm1, %v1434_v31  ;;  %v1234_v33 = vpop.f32.mrf.mxu2  ;;  %1765 = vrot.lane.b32.xlu2 %v1485_v30, %s4589_s19  ;;  %v4395_v30 = vld [vmem:[%s5575_s3 + $0x30] sm:$0xff] }
  0xe5   : > { %v1235_v35 = vadd.f32 %v4757_v27, %v1234_v33  ;;  %v1107_v36 = vpop.f32.mrf.mxu0  ;;  %v1202_v37 = vpop.f32.mrf.mxu1  ;;  %2785 = vmatpush.bf16.msrb.mxu1 %v4395_v30 }
  0xe6   : > { %v1203_v38 = vadd.f32 %v4757_v27, %v1202_v37  ;;  %v1108_v43 = vadd.f32 %v4757_v27, %v1107_v36  ;;  %v4368_v36 = vld [vmem:[%s4704_s27 + $0x160] sm:$0xff]  ;;  %v4394_v37 = vld [vmem:[%s5575_s3 + $0x28] sm:$0xff] }
  0xe7   : > { %v1388_v39 = vmax.f32 %v1235_v35, 0.0 }
  0xe8   : > { %v1375_v41 = vmax.f32 %v1203_v38, 0.0  ;;  %3705 = vmatmul.msk.bf16.gmra.mxu0 %vm925_vm0, %v4337_v34  ;;  %v1337_v47 = vmax.f32 %v1108_v43, 0.0 }
  0xe9   : > { %v1486_v42 = vpack.c.bf16 %v1388_v39, %v1388_v39  ;;  %3736 = vmatmul.msk.bf16.gmra.mxu3 %vm925_vm0, %v4368_v36  ;;  %2786 = vmatpush.bf16.msrb.mxu1 %v4394_v37 }
  0xea   : > { %v1473_v44 = vpack.c.bf16 %v1375_v41, %v1375_v41  ;;  %v1435_v54 = vpack.c.bf16 %v1337_v47, %v1337_v47 }
  0xeb   : > { %1767 = vrot.lane.b32.xlu0 %v1486_v42, %s4589_s19  ;;  %v4393_v42 = vld [vmem:[%s5575_s3 + $0x20] sm:$0xff] }
  0xec   : > { %1719 = vst.msk [vmem:[#allocation2 + $0x18] sm:$0xf] %vm1523_vm1, %v1473_v44  ;;  %v1237_v46 = vpop.f32.mrf.mxu2  ;;  %1713 = vrot.lane.b32.xlu2 %v1472_v40, %s4588_s18 }
  0xed   : > { %v1238_v48 = vadd.f32 %v4757_v27, %v1237_v46  ;;  %v1109_v49 = vpop.f32.mrf.mxu0  ;;  %v1204_v50 = vpop.f32.mrf.mxu1  ;;  %2787 = vmatpush.bf16.msrb.mxu1 %v4393_v42 }
  0xee   : > { %v1205_v51 = vadd.f32 %v4757_v27, %v1204_v50  ;;  %v1110_v56 = vadd.f32 %v4757_v27, %v1109_v49  ;;  %v4340_v50 = vld [vmem:[%s4704_s27 + $0x80] sm:$0xff] }
  0xef   : > { %v1389_v52 = vmax.f32 %v1238_v48, 0.0  ;;  %v4392_v48 = vld [vmem:[%s5575_s3 + $0x18] sm:$0xff] }
  0xf0   : > { %v1376_v53 = vmax.f32 %v1205_v51, 0.0  ;;  %v1338_v60 = vmax.f32 %v1110_v56, 0.0 }
  0xf1   : > { %v1487_v55 = vpack.c.bf16 %v1389_v52, %v1389_v52  ;;  %2788 = vmatpush.bf16.msrb.mxu1 %v4392_v48  ;;  %v4371_v48 = vld [vmem:[%s4704_s27 + $0x178] sm:$0xff] }
  0xf2   : > { %v1474_v57 = vpack.c.bf16 %v1376_v53, %v1376_v53  ;;  %v1436_v3 = vpack.c.bf16 %v1338_v60, %v1338_v60  ;;  %v4390_v60 = vld [vmem:[%s5575_s3 + $0x8] sm:$0xff] }
  0xf3   : > { %1775 = vrot.lane.b32.xlu1 %v1487_v55, %s4588_s18  ;;  %1563 = vrot.lane.b32.xlu0 %v1435_v54, %s4590_s20  ;;  %v4391_v54 = vld [vmem:[%s5575_s3 + $0x10] sm:$0xff] }
  0xf4   : > { %1720 = vst.msk [vmem:[#allocation2 + $0x4c] sm:$0xf] %vm1523_vm1, %v1474_v57  ;;  %v1239_v58 = vpop.f32.mrf.mxu2 }
  0xf5   : > { %v1240_v61 = vadd.f32 %v4757_v27, %v1239_v58  ;;  %v1112_v62 = vpop.f32.mrf.mxu0  ;;  %v1207_v63 = vpop.f32.mrf.mxu1  ;;  %2789 = vmatpush.bf16.msrb.mxu1 %v4391_v54 }
  0xf6   : > { %v1208_v0 = vadd.f32 %v4757_v27, %v1207_v63  ;;  %v1113_v5 = vadd.f32 %v4757_v27, %v1112_v62 }
  0xf7   : > { %v1390_v1 = vmax.f32 %v1240_v61, 0.0 }
  0xf8   : > { %v1377_v2 = vmax.f32 %v1208_v0, 0.0  ;;  %3706 = vmatmul.msk.bf16.gmra.mxu0 %vm925_vm0, %v4338_v59  ;;  %v1339_v9 = vmax.f32 %v1113_v5, 0.0  ;;  %v4369_v59 = vld [vmem:[%s4704_s27 + $0x168] sm:$0xff] }
  0xf9   : > { %v1488_v4 = vpack.c.bf16 %v1390_v1, %v1390_v1  ;;  %3737 = vmatmul.msk.bf16.gmra.mxu3 %vm925_vm0, %v4369_v59  ;;  %2790 = vmatpush.bf16.msrb.mxu1 %v4390_v60 }
  0xfa   : > { %v1475_v6 = vpack.c.bf16 %v1377_v2, %v1377_v2  ;;  %v1437_v19 = vpack.c.bf16 %v1339_v9, %v1339_v9 }
  0xfb   : > { %1777 = vrot.lane.b32.xlu2 %v1488_v4, %s4588_s18  ;;  %1565 = vrot.lane.b32.xlu1 %v1436_v3, %s4590_s20  ;;  %v4389_v4 = vld [vmem:[%s5575_s3] sm:$0xff] }
  0xfc   : > { %v1242_v8 = vpop.f32.mrf.mxu2  ;;  %1723 = vrot.lane.b32.xlu0 %v1475_v6, %s4590_s20 }
  0xfd   : > { %v1243_v10 = vadd.f32 %v4757_v27, %v1242_v8  ;;  %v1114_v11 = vpop.f32.mrf.mxu0  ;;  %v1209_v12 = vpop.f32.mrf.mxu1  ;;  %2791 = vmatpush.bf16.msrb.mxu1 %v4389_v4 }
  0xfe   : > { %v1115_v13 = vadd.f32 %v4757_v27, %v1114_v11  ;;  %v1210_v14 = vadd.f32 %v4757_v27, %v1209_v12  ;;  %v4871_v15 = vpop.permute.xlu2 %1733 }
  0xff   : > { %v1391_v16 = vmax.f32 %v1243_v10, 0.0  ;;  %v4341_v10 = vld [vmem:[%s4704_s27 + $0x88] sm:$0xff] }
 0x100   : > { %v1340_v17 = vmax.f32 %v1115_v13, 0.0  ;;  %v1378_v18 = vmax.f32 %v1210_v14, 0.0 }
 0x101   : > { %v1489_v20 = vpack.c.bf16 %v1391_v16, %v1391_v16 }
 0x102   : > { %v1438_v21 = vpack.c.bf16 %v1340_v17, %v1340_v17  ;;  %v1476_v22 = vpack.c.bf16 %v1378_v18, %v1378_v18 }
 0x103   : > { %1783 = vst.msk [vmem:[#allocation2 + $0x20] sm:$0xf] %vm1523_vm1, %v1489_v20  ;;  %1573 = vrot.lane.b32.xlu2 %v1437_v19, %s4589_s19  ;;  %v4370_v20 = vld [vmem:[%s4704_s27 + $0x170] sm:$0xff] }
 0x104   : > { %v1244_v24 = vpop.f32.mrf.mxu2  ;;  %1725 = vrot.lane.b32.xlu1 %v1476_v22, %s4590_s20  ;;  %1575 = vrot.lane.b32.xlu0 %v1438_v21, %s4589_s19 }
 0x105   : > { %v1245_v26 = vadd.f32 %v4757_v27, %v1244_v24  ;;  %v1117_v28 = vpop.f32.mrf.mxu0 }
 0x106   : > { %v1118_v29 = vadd.f32 %v4757_v27, %v1117_v28  ;;  %v4887_v33 = vpop.permute.xlu2 %1829 }
 0x107   : > { %v1392_v31 = vmax.f32 %v1245_v26, 0.0 }
 0x108   : > { %v1341_v32 = vmax.f32 %v1118_v29, 0.0  ;;  %3707 = vmatmul.msk.bf16.gmra.mxu0 %vm925_vm0, %v4339_v25 }
 0x109   : > { %v1490_v34 = vpack.c.bf16 %v1392_v31, %v1392_v31  ;;  %3738 = vmatmul.msk.bf16.gmra.mxu3 %vm925_vm0, %v4370_v20 }
 0x10a   : > { %v1439_v35 = vpack.c.bf16 %v1341_v32, %v1341_v32 }
 0x10b   : > { %1784 = vst.msk [vmem:[#allocation2 + $0x54] sm:$0xf] %vm1523_vm1, %v1490_v34 }
 0x10c   : > { %v1247_v38 = vpop.f32.mrf.mxu2  ;;  %1583 = vrot.lane.b32.xlu1 %v1439_v35, %s4588_s18  ;;  %v4342_v35 = vld [vmem:[%s4704_s27 + $0x90] sm:$0xff] }
 0x10d   : > { %v1248_v39 = vadd.f32 %v4757_v27, %v1247_v38  ;;  %v1119_v40 = vpop.f32.mrf.mxu0 }
 0x10e   : > { %v1120_v41 = vadd.f32 %v4757_v27, %v1119_v40  ;;  %v4901_v47 = vpop.permute.xlu2 %1681  ;;  %v4919_v61 = vpop.permute.xlu1 %1679 }
 0x10f   : > { %v1393_v43 = vmax.f32 %v1248_v39, 0.0 }
 0x110   : > { %v1342_v44 = vmax.f32 %v1120_v41, 0.0 }
 0x111   : > { %v1491_v45 = vpack.c.bf16 %v1393_v43, %v1393_v43  ;;  %v4958_v43 = vpop.f32.mrf.mxu3 }
 0x112   : > { %v1440_v46 = vpack.c.bf16 %v1342_v44, %v1342_v44 }
 0x113   : > { %1787 = vrot.lane.b32.xlu0 %v1491_v45, %s4590_s20 }
 0x114   : > { %v1249_v49 = vpop.f32.mrf.mxu2  ;;  %1585 = vrot.lane.b32.xlu2 %v1440_v46, %s4588_s18 }
 0x115   : > { %v1250_v51 = vadd.f32 %v4757_v27, %v1249_v49  ;;  %v1122_v52 = vpop.f32.mrf.mxu0 }
 0x116   : > { %v1123_v53 = vadd.f32 %v4757_v27, %v1122_v52  ;;  %v4923_v63 = vpop.permute.xlu2 %1745 }
 0x117   : > { %v1394_v55 = vmax.f32 %v1250_v51, 0.0 }
 0x118   : > { %v1343_v56 = vmax.f32 %v1123_v53, 0.0  ;;  %3708 = vmatmul.msk.bf16.gmra.mxu0 %vm925_vm0, %v4340_v50 }
 0x119   : > { %v1492_v57 = vpack.c.bf16 %v1394_v55, %v1394_v55  ;;  %3739 = vmatmul.msk.bf16.gmra.mxu3 %vm925_vm0, %v4371_v48 }
 0x11a   : > { %v1441_v58 = vpack.c.bf16 %v1343_v56, %v1343_v56  ;;  %v4969_v60 = vpop.f32.mrf.mxu3 }
 0x11b   : > { %1789 = vrot.lane.b32.xlu1 %v1492_v57, %s4590_s20 }
 0x11c   : > { %1591 = vst.msk [vmem:[#allocation2 + $0x8] sm:$0xf] %vm1523_vm1, %v1441_v58  ;;  %v1252_v62 = vpop.f32.mrf.mxu2 }
 0x11d   : > { %v1253_v0 = vadd.f32 %v4757_v27, %v1252_v62  ;;  %v4926_v1 = vpop.permute.xlu0 %1735  ;;  %v1124_v2 = vpop.f32.mrf.mxu0 }
 0x11e   : > { %v1125_v3 = vadd.f32 %v4757_v27, %v1124_v2 }
 0x11f   : > { %v1395_v5 = vmax.f32 %v1253_v0, 0.0 }
 0x120   : > { %v1344_v6 = vmax.f32 %v1125_v3, 0.0 }
 0x121   : > { %v1493_v7 = vpack.c.bf16 %v1395_v5, %v1395_v5 }
 0x122   : > { %v1442_v8 = vpack.c.bf16 %v1344_v6, %v1344_v6 }
 0x123   : > { %1797 = vrot.lane.b32.xlu2 %v1493_v7, %s4589_s19 }
 0x124   : > { %1592 = vst.msk [vmem:[#allocation2 + $0x3c] sm:$0xf] %vm1523_vm1, %v1442_v8  ;;  %v1254_v9 = vpop.f32.mrf.mxu2 }
 0x125   : > { %v1255_v11 = vadd.f32 %v4757_v27, %v1254_v9  ;;  %v1529_v12 = vpop.permute.xlu0 %1528  ;;  %v1127_v13 = vpop.f32.mrf.mxu0 }
 0x126   : > { %1535 = vst.msk [vmem:[#allocation2] sm:$0xf] %vm1534_vm2, %v1529_v12  ;;  %v4938_v14 = vpop.permute.xlu1 %1743  ;;  %v1551_v16 = vpop.permute.xlu2 %1550  ;;  %v1128_v19 = vadd.f32 %v4757_v27, %v1127_v13 }
 0x127   : > { %v1396_v17 = vmax.f32 %v1255_v11, 0.0  ;;  %v4978_v11 = vpop.f32.mrf.mxu3 }
 0x128   : > { %3709 = vmatmul.msk.bf16.gmra.mxu0 %vm925_vm0, %v4341_v10  ;;  %v1345_v22 = vmax.f32 %v1128_v19, 0.0 }
 0x129   : > { %v1494_v18 = vpack.c.bf16 %v1396_v17, %v1396_v17 }
 0x12a   : > { %v1443_v30 = vpack.c.bf16 %v1345_v22, %v1345_v22 }
 0x12b   : > { %1799 = vrot.lane.b32.xlu0 %v1494_v18, %s4589_s19 }
 0x12c   : > { %v1257_v21 = vpop.f32.mrf.mxu2 }
 0x12d   : > { %v1258_v23 = vadd.f32 %v4757_v27, %v1257_v21  ;;  %v1531_v24 = vpop.permute.xlu0 %1530  ;;  %v1129_v25 = vpop.f32.mrf.mxu0 }
 0x12e   : > { %1536 = vst.msk [vmem:[#allocation2 + $0x34] sm:$0xf] %vm1534_vm2, %v1531_v24  ;;  %v1702_v26 = vpop.permute.xlu2 %1701  ;;  %v1540_v28 = vpop.permute.xlu1 %1539  ;;  %v1130_v32 = vadd.f32 %v4757_v27, %v1129_v25 }
 0x12f   : > { %v1397_v29 = vmax.f32 %v1258_v23, 0.0  ;;  %1546 = vst.msk [vmem:[#allocation2] sm:$0xf] %vm1545_vm3, %v1540_v28  ;;  %v4403_v23 = vld [vmem:[%s5575_s3 + $0x70] sm:$0xff]  ;;  %v1282_v28 = vpop.f32.mrf.mxu3 }
 0x130   : > { %1557 = vst.msk [vmem:[#allocation2] sm:$0xf] %vm1556_vm4, %v1551_v16  ;;  %v1346_v36 = vmax.f32 %v1130_v32, 0.0  ;;  %v4404_v16 = vld [vmem:[%s5575_s3 + $0x78] sm:$0xff]  ;;  %v1283_v32 = vadd.f32 %v4757_v27, %v1282_v28  ;;  %v4410_v28 = vld [vmem:[%s5575_s3 + $0xa8] sm:$0xff] }
 0x131   : > { %v1495_v31 = vpack.c.bf16 %v1397_v29, %v1397_v29  ;;  %2798 = vmatpush.bf16.msrb.mxu2 %v4404_v16 }
 0x132   : > { %v1444_v44 = vpack.c.bf16 %v1346_v36, %v1346_v36 }
 0x133   : > { %1807 = vrot.lane.b32.xlu1 %v1495_v31, %s4588_s18  ;;  %1595 = vrot.lane.b32.xlu0 %v1443_v30, %s4590_s20  ;;  %v4402_v31 = vld [vmem:[%s5575_s3 + $0x68] sm:$0xff] }
 0x134   : > { %v1259_v34 = vpop.f32.mrf.mxu2 }
 0x135   : > { %v1260_v37 = vadd.f32 %v4757_v27, %v1259_v34  ;;  %v1132_v38 = vpop.f32.mrf.mxu0  ;;  %v1692_v39 = vpop.permute.xlu0 %1691  ;;  %2799 = vmatpush.bf16.msrb.mxu2 %v4403_v23 }
 0x136   : > { %v1553_v40 = vpop.permute.xlu2 %1552  ;;  %v1542_v41 = vpop.permute.xlu1 %1541  ;;  %1697 = vst.msk [vmem:[#allocation2 + $0x14] sm:$0xf] %vm1534_vm2, %v1692_v39  ;;  %v1133_v46 = vadd.f32 %v4757_v27, %v1132_v38 }
 0x137   : > { %v1398_v42 = vmax.f32 %v1260_v37, 0.0  ;;  %1547 = vst.msk [vmem:[#allocation2 + $0x34] sm:$0xf] %vm1545_vm3, %v1542_v41  ;;  %v3743_v54 = vld [vmem:[#allocation2] sm:$0xf]  ;;  %v1407_v37 = vmax.f32 %v1283_v32, 0.0 }
 0x138   : > { %1558 = vst.msk [vmem:[#allocation2 + $0x34] sm:$0xf] %vm1556_vm4, %v1553_v40  ;;  %3710 = vmatmul.msk.bf16.gmra.mxu0 %vm925_vm0, %v4342_v35  ;;  %v1347_v50 = vmax.f32 %v1133_v46, 0.0  ;;  %v4401_v40 = vld [vmem:[%s5575_s3 + $0x60] sm:$0xff] }
 0x139   : > { %v1496_v45 = vpack.c.bf16 %v1398_v42, %v1398_v42  ;;  %1707 = vst.msk [vmem:[#allocation2 + $0x14] sm:$0xf] %vm1545_vm3, %v1702_v26  ;;  %2800 = vmatpush.bf16.msrb.mxu2 %v4402_v31  ;;  %v1505_v42 = vpack.c.bf16 %v1407_v37, %v1407_v37  ;;  %v5071_v31 = vld [vmem:[%s5574_s2] ss:$0 sm:$0xff] }
 0x13a   : > { %v1445_v62 = vpack.c.bf16 %v1347_v50, %v1347_v50 }
 0x13b   : > { %1809 = vrot.lane.b32.xlu2 %v1496_v45, %s4588_s18  ;;  %1597 = vrot.lane.b32.xlu1 %v1444_v44, %s4590_s20  ;;  %v1284_v45 = vpop.f32.mrf.mxu3  ;;  %1847 = vst.msk [vmem:[#allocation2 + $0x28] sm:$0xf] %vm1523_vm1, %v1505_v42 }
 0x13c   : > { %v1262_v49 = vpop.f32.mrf.mxu2  ;;  %v1285_v48 = vadd.f32 %v4757_v27, %v1284_v45 }
 0x13d   : > { %v1263_v51 = vadd.f32 %v4757_v27, %v1262_v49  ;;  %v1134_v52 = vpop.f32.mrf.mxu0  ;;  %2801 = vmatpush.bf16.msrb.mxu2 %v4401_v40 }
 0x13e   : > { %v1135_v53 = vadd.f32 %v4757_v27, %v1134_v52  ;;  %v1694_v55 = vpop.permute.xlu1 %1693  ;;  %v1766_v4 = vpop.permute.xlu2 %1765  ;;  %v1408_v50 = vmax.f32 %v1285_v48, 0.0 }
 0x13f   : > { %v1399_v56 = vmax.f32 %v1263_v51, 0.0  ;;  %v4382_v57 = vld [vmem:[#allocation2 + $0x30] sm:$0xf0]  ;;  %1698 = vst.msk [vmem:[#allocation2 + $0x48] sm:$0xf] %vm1534_vm2, %v1694_v55  ;;  %v4400_v51 = vld [vmem:[%s5575_s3 + $0x58] sm:$0xff] }
 0x140   : > { %v1348_v58 = vmax.f32 %v1135_v53, 0.0  ;;  %v3744_v59 = vor.u32 %v4382_v57, %v3743_v54  ;;  %v1506_v54 = vpack.c.bf16 %v1408_v50, %v1408_v50  ;;  %v4399_v57 = vld [vmem:[%s5575_s3 + $0x50] sm:$0xff]  ;;  %v4406_v50 = vld [vmem:[%s5575_s3 + $0x88] sm:$0xff] }
 0x141   : > { %v1497_v0 = vpack.c.bf16 %v1399_v56, %v1399_v56  ;;  %2802 = vmatpush.bf16.msrb.mxu2 %v4400_v51 }
 0x142   : > { %v1446_v2 = vpack.c.bf16 %v1348_v58, %v1348_v58  ;;  %2792 = vmatmul.bf16.vlgmr.msrb.gmra.mxu1 %v3744_v59  ;;  %1848 = vst.msk [vmem:[#allocation2 + $0x5c] sm:$0xf] %vm1523_vm1, %v1506_v54 }
 0x143   : > { %1815 = vst.msk [vmem:[#allocation2 + $0x24] sm:$0xf] %vm1523_vm1, %v1497_v0  ;;  %1605 = vrot.lane.b32.xlu2 %v1445_v62, %s4589_s19  ;;  %v5019_v59 = vpop.f32.mrf.mxu3  ;;  %v4398_v0 = vld [vmem:[%s5575_s3 + $0x48] sm:$0xff] }
 0x144   : > { %v1264_v3 = vpop.f32.mrf.mxu2  ;;  %1607 = vrot.lane.b32.xlu0 %v1446_v2, %s4589_s19 }
 0x145   : > { %v1265_v5 = vadd.f32 %v4757_v27, %v1264_v3  ;;  %v1137_v6 = vpop.f32.mrf.mxu0  ;;  %v1756_v7 = vpop.permute.xlu0 %1755  ;;  %2803 = vmatpush.bf16.msrb.mxu2 %v4399_v57 }
 0x146   : > { %v1138_v8 = vadd.f32 %v4757_v27, %v1137_v6  ;;  %1761 = vst.msk [vmem:[#allocation2 + $0x1c] sm:$0xf] %vm1534_vm2, %v1756_v7  ;;  %v1714_v25 = vpop.permute.xlu2 %1713  ;;  %v4397_v7 = vld [vmem:[%s5575_s3 + $0x40] sm:$0xff] }
 0x147   : > { %v1400_v9 = vmax.f32 %v1265_v5, 0.0  ;;  %1771 = vst.msk [vmem:[#allocation2 + $0x1c] sm:$0xf] %vm1545_vm3, %v1766_v4 }
 0x148   : > { %v1349_v10 = vmax.f32 %v1138_v8, 0.0 }
 0x149   : > { %v1498_v12 = vpack.c.bf16 %v1400_v9, %v1400_v9  ;;  %2804 = vmatpush.bf16.msrb.mxu2 %v4398_v0 }
 0x14a   : > { %v1447_v13 = vpack.c.bf16 %v1349_v10, %v1349_v10 }
 0x14b   : > { %1816 = vst.msk [vmem:[#allocation2 + $0x58] sm:$0xf] %vm1523_vm1, %v1498_v12  ;;  %v5032_v9 = vpop.f32.mrf.mxu3  ;;  %v4412_v12 = vld [vmem:[%s5575_s3 + $0xb8] sm:$0xff] }
 0x14c   : > { %v1267_v17 = vpop.f32.mrf.mxu2  ;;  %1615 = vrot.lane.b32.xlu1 %v1447_v13, %s4588_s18  ;;  %2812 = vmatpush.bf16.msrb.mxu3 %v4412_v12 }
 0x14d   : > { %v1268_v18 = vadd.f32 %v4757_v27, %v1267_v17  ;;  %v1139_v19 = vpop.f32.mrf.mxu0  ;;  %v1758_v20 = vpop.permute.xlu1 %1757  ;;  %2805 = vmatpush.bf16.msrb.mxu2 %v4397_v7 }
 0x14e   : > { %v1140_v21 = vadd.f32 %v4757_v27, %v1139_v19  ;;  %1762 = vst.msk [vmem:[#allocation2 + $0x50] sm:$0xf] %vm1534_vm2, %v1758_v20  ;;  %v1704_v22 = vpop.permute.xlu0 %1703 }
 0x14f   : > { %v1401_v24 = vmax.f32 %v1268_v18, 0.0  ;;  %1708 = vst.msk [vmem:[#allocation2 + $0x48] sm:$0xf] %vm1545_vm3, %v1704_v22  ;;  %v4411_v22 = vld [vmem:[%s5575_s3 + $0xb0] sm:$0xff] }
 0x150   : > { %v1350_v26 = vmax.f32 %v1140_v21, 0.0  ;;  %1718 = vst.msk [vmem:[#allocation2 + $0x48] sm:$0xf] %vm1556_vm4, %v1714_v25  ;;  %2813 = vmatpush.bf16.msrb.mxu3 %v4411_v22 }
 0x151   : > { %v1499_v29 = vpack.c.bf16 %v1401_v24, %v1401_v24 }
 0x152   : > { %v1448_v30 = vpack.c.bf16 %v1350_v26, %v1350_v26 }
 0x153   : > { %1819 = vrot.lane.b32.xlu0 %v1499_v29, %s4590_s20  ;;  %v5043_v20 = vpop.f32.mrf.mxu3 }
 0x154   : > { %1617 = vrot.lane.b32.xlu2 %v1448_v30, %s4588_s18  ;;  %v1269_v34 = vpop.f32.mrf.mxu2  ;;  %2814 = vmatpush.bf16.msrb.mxu3 %v4410_v28 }
 0x155   : > { %v1142_v35 = vpop.f32.mrf.mxu0  ;;  %v1270_v36 = vadd.f32 %v4757_v27, %v1269_v34  ;;  %v1712_v39 = vpop.permute.xlu1 %1711 }
 0x156   : > { %v1143_v38 = vadd.f32 %v4757_v27, %v1142_v35  ;;  %1717 = vst.msk [vmem:[#allocation2 + $0x14] sm:$0xf] %vm1556_vm4, %v1712_v39  ;;  %v1778_v52 = vpop.permute.xlu2 %1777  ;;  %v4407_v39 = vld [vmem:[%s5575_s3 + $0x90] sm:$0xff] }
 0x157   : > { %v1402_v41 = vmax.f32 %v1270_v36, 0.0  ;;  %v4408_v36 = vld [vmem:[%s5575_s3 + $0x98] sm:$0xff] }
 0x158   : > { %v1351_v44 = vmax.f32 %v1143_v38, 0.0 }
 0x159   : > { %v1500_v46 = vpack.c.bf16 %v1402_v41, %v1402_v41 }
 0x15a   : > { %v1449_v49 = vpack.c.bf16 %v1351_v44, %v1351_v44 }
 0x15b   : > { %1821 = vrot.lane.b32.xlu1 %v1500_v46, %s4590_s20 }
 0x15c   : > { %1623 = vst.msk [vmem:[#allocation2 + $0xc] sm:$0xf] %vm1523_vm1, %v1449_v49 }
 0x15d   : > { %v1768_v53 = vpop.permute.xlu0 %1767  ;;  %v1144_v55 = vpop.f32.mrf.mxu0 }
 0x15e   : > { %1772 = vst.msk [vmem:[#allocation2 + $0x50] sm:$0xf] %vm1545_vm3, %v1768_v53  ;;  %v1145_v56 = vadd.f32 %v4757_v27, %v1144_v55  ;;  %v1574_v5 = vpop.permute.xlu2 %1573  ;;  %v4436_v55 = vld [vmem:[%s5575_s3 + $0x178] sm:$0xff] }
 0x15f   : > { %1782 = vst.msk [vmem:[#allocation2 + $0x50] sm:$0xf] %vm1556_vm4, %v1778_v52  ;;  %v4405_v52 = vld [vmem:[%s5575_s3 + $0x80] sm:$0xff] }
 0x160   : > { %v1352_v58 = vmax.f32 %v1145_v56, 0.0 }
 0x162   : > { %v1450_v62 = vpack.c.bf16 %v1352_v58, %v1352_v58 }
 0x164   : > { %1624 = vst.msk [vmem:[#allocation2 + $0x40] sm:$0xf] %vm1523_vm1, %v1450_v62  ;;  %v4435_v62 = vld [vmem:[%s5575_s3 + $0x170] sm:$0xff] }
 0x165   : > { %v1776_v2 = vpop.permute.xlu1 %1775  ;;  %v1564_v3 = vpop.permute.xlu0 %1563 }
 0x166   : > { %1781 = vst.msk [vmem:[#allocation2 + $0x1c] sm:$0xf] %vm1556_vm4, %v1776_v2  ;;  %v1147_v4 = vpop.f32.mrf.mxu0 }
 0x167   : > { %1569 = vst.msk [vmem:[#allocation2 + $0x4] sm:$0xf] %vm1534_vm2, %v1564_v3  ;;  %v1148_v6 = vadd.f32 %v4757_v27, %v1147_v4 }
 0x168   : > { %1579 = vst.msk [vmem:[#allocation2 + $0x4] sm:$0xf] %vm1545_vm3, %v1574_v5  ;;  %v4434_v5 = vld [vmem:[%s5575_s3 + $0x168] sm:$0xff] }
 0x169   : > { %v1353_v8 = vmax.f32 %v1148_v6, 0.0 }
 0x16b   : > { %v1451_v10 = vpack.c.bf16 %v1353_v8, %v1353_v8 }
 0x16d   : > { %v1566_v13 = vpop.permute.xlu1 %1565  ;;  %1627 = vrot.lane.b32.xlu0 %v1451_v10, %s4590_s20 }
 0x16e   : > { %1570 = vst.msk [vmem:[#allocation2 + $0x38] sm:$0xf] %vm1534_vm2, %v1566_v13  ;;  %v1149_v16 = vpop.f32.mrf.mxu0  ;;  %v1724_v18 = vpop.permute.xlu0 %1723  ;;  %v4372_v13 = vld [vmem:[%s4704_s27 + $0x180] sm:$0xff] }
 0x16f   : > { %v1150_v17 = vadd.f32 %v4757_v27, %v1149_v16  ;;  %1729 = vst.msk [vmem:[#allocation2 + $0x18] sm:$0xf] %vm1534_vm2, %v1724_v18  ;;  %v1586_v29 = vpop.permute.xlu2 %1585  ;;  %v4433_v16 = vld [vmem:[%s5575_s3 + $0x160] sm:$0xff]  ;;  %3740 = vmatmul.msk.bf16.gmra.mxu3 %vm925_vm0, %v4372_v13 }
 0x170   : > { %1739 = vst.msk [vmem:[#allocation2 + $0x18] sm:$0xf] %vm1545_vm3, %v4871_v15 }
 0x171   : > { %v1354_v19 = vmax.f32 %v1150_v17, 0.0  ;;  %1749 = vst.msk [vmem:[#allocation2 + $0x18] sm:$0xf] %vm1556_vm4, %v4938_v14  ;;  %v5057_v14 = vpop.f32.mrf.mxu3 }
 0x173   : > { %v1452_v21 = vpack.c.bf16 %v1354_v19, %v1354_v19 }
 0x175   : > { %1629 = vrot.lane.b32.xlu1 %v1452_v21, %s4590_s20 }
 0x176   : > { %v1152_v23 = vpop.f32.mrf.mxu0  ;;  %v1726_v24 = vpop.permute.xlu1 %1725 }
 0x177   : > { %v1153_v25 = vadd.f32 %v4757_v27, %v1152_v23  ;;  %1730 = vst.msk [vmem:[#allocation2 + $0x4c] sm:$0xf] %vm1534_vm2, %v1726_v24  ;;  %v1576_v15 = vpop.permute.xlu0 %1575  ;;  %v4432_v24 = vld [vmem:[%s5575_s3 + $0x158] sm:$0xff] }
 0x178   : > { %1740 = vst.msk [vmem:[#allocation2 + $0x4c] sm:$0xf] %vm1545_vm3, %v4926_v1  ;;  %v4409_v1 = vld [vmem:[%s5575_s3 + $0xa0] sm:$0xff] }
 0x179   : > { %v1355_v26 = vmax.f32 %v1153_v25, 0.0  ;;  %1750 = vst.msk [vmem:[#allocation2 + $0x4c] sm:$0xf] %vm1556_vm4, %v4923_v63  ;;  %2815 = vmatpush.bf16.msrb.mxu3 %v4409_v1  ;;  %v5075_v35 = vpop.f32.mrf.mxu3 }
 0x17a   : > { %1580 = vst.msk [vmem:[#allocation2 + $0x38] sm:$0xf] %vm1545_vm3, %v1576_v15 }
 0x17b   : > { %v1453_v27 = vpack.c.bf16 %v1355_v26, %v1355_v26  ;;  %1590 = vst.msk [vmem:[#allocation2 + $0x38] sm:$0xf] %vm1556_vm4, %v1586_v29  ;;  %v4431_v26 = vld [vmem:[%s5575_s3 + $0x150] sm:$0xff] }
 0x17d   : > { %1637 = vrot.lane.b32.xlu2 %v1453_v27, %s4589_s19  ;;  %2816 = vmatpush.bf16.msrb.mxu3 %v4408_v36  ;;  %v1798_v44 = vpop.permute.xlu2 %1797 }
 0x17e   : > { %v1154_v63 = vpop.f32.mrf.mxu0  ;;  %v1584_v30 = vpop.permute.xlu1 %1583 }
 0x17f   : > { %v1155_v32 = vadd.f32 %v5071_v31, %v1154_v63  ;;  %1589 = vst.msk [vmem:[#allocation2 + $0x4] sm:$0xf] %vm1556_vm4, %v1584_v30  ;;  %v4430_v30 = vld [vmem:[%s5575_s3 + $0x148] sm:$0xff] }
 0x181   : > { %v1356_v34 = vmax.f32 %v1155_v32, 0.0  ;;  %2817 = vmatpush.bf16.msrb.mxu3 %v4407_v39  ;;  %v5087_v49 = vpop.f32.mrf.mxu3 }
 0x182   : > { %v3745_v42 = vld [vmem:[#allocation2 + $0x34] sm:$0xf0] }
 0x183   : > { %v1454_v37 = vpack.c.bf16 %v1356_v34, %v1356_v34 }
 0x185   : > { %1639 = vrot.lane.b32.xlu0 %v1454_v37, %s4589_s19  ;;  %v1788_v38 = vpop.permute.xlu0 %1787  ;;  %2818 = vmatpush.bf16.msrb.mxu3 %v4406_v50  ;;  %v4429_v37 = vld [vmem:[%s5575_s3 + $0x140] sm:$0xff] }
 0x186   : > { %v1157_v40 = vpop.f32.mrf.mxu0  ;;  %v4376_v41 = vld [vmem:[#allocation2 + $0x4] sm:$0xf]  ;;  %1793 = vst.msk [vmem:[#allocation2 + $0x20] sm:$0xf] %vm1534_vm2, %v1788_v38 }
 0x187   : > { %v1158_v45 = vadd.f32 %v5071_v31, %v1157_v40  ;;  %v3748_v46 = vor.u32 %v4376_v41, %v3745_v42  ;;  %1803 = vst.msk [vmem:[#allocation2 + $0x20] sm:$0xf] %vm1545_vm3, %v1798_v44 }
 0x189   : > { %v1357_v48 = vmax.f32 %v1158_v45, 0.0  ;;  %2806 = vmatmul.bf16.vlgmr.msrb.gmra.mxu2 %v3748_v46  ;;  %2819 = vmatpush.bf16.msrb.mxu3 %v4405_v52  ;;  %v1302_v58 = vpop.f32.mrf.mxu3  ;;  %v1278_v45 = vadd.f32 %v5071_v31, %v4969_v60 }
 0x18a   : > { %v1303_v2 = vadd.f32 %v5071_v31, %v1302_v58 }
 0x18b   : > { %v1455_v51 = vpack.c.bf16 %v1357_v48, %v1357_v48 }
 0x18c   : > { %v1415_v3 = vmax.f32 %v1303_v2, 0.0 }
 0x18d   : > { %1647 = vrot.lane.b32.xlu1 %v1455_v51, %s4588_s18  ;;  %v1790_v53 = vpop.permute.xlu1 %1789  ;;  %2854 = vmatpush.bf16.msra.mxu3 %v4436_v55  ;;  %v1405_v51 = vmax.f32 %v1278_v45, 0.0  ;;  %v1295_v45 = vadd.f32 %v5071_v31, %v5057_v14  ;;  %v4456_v14 = vld [vmem:[%s5575_s3 + $0x218] sm:$0xff] }
 0x18e   : > { %v1159_v54 = vpop.f32.mrf.mxu0  ;;  %1794 = vst.msk [vmem:[#allocation2 + $0x54] sm:$0xf] %vm1534_vm2, %v1790_v53  ;;  %v1513_v7 = vpack.c.bf16 %v1415_v3, %v1415_v3  ;;  %v4420_v3 = vld [vmem:[%s5575_s3 + $0xf8] sm:$0xff] }
 0x18f   : > { %v1160_v56 = vadd.f32 %v5071_v31, %v1159_v54  ;;  %v1503_v60 = vpack.c.bf16 %v1405_v51, %v1405_v51  ;;  %2826 = vmatpush.bf16.msra.mxu1 %v4420_v3 }
 0x190   : > { %1879 = vst.msk [vmem:[#allocation2 + $0x2c] sm:$0xf] %vm1523_vm1, %v1513_v7 }
 0x191   : > { %v1358_v57 = vmax.f32 %v1160_v56, 0.0  ;;  %2855 = vmatpush.bf16.msra.mxu3 %v4435_v62  ;;  %v1304_v10 = vpop.f32.mrf.mxu3  ;;  %v1280_v56 = vadd.f32 %v5071_v31, %v4978_v11 }
 0x192   : > { %v1305_v12 = vadd.f32 %v5071_v31, %v1304_v10  ;;  %v1293_v10 = vadd.f32 %v5071_v31, %v5043_v20  ;;  %v4460_v20 = vld [vmem:[%s5575_s3 + $0x238] sm:$0xff] }
 0x193   : > { %v1456_v0 = vpack.c.bf16 %v1358_v57, %v1358_v57  ;;  %v1290_v57 = vadd.f32 %v5071_v31, %v5032_v9  ;;  %v1406_v62 = vmax.f32 %v1280_v56, 0.0  ;;  %v4419_v9 = vld [vmem:[%s5575_s3 + $0xf0] sm:$0xff] }
 0x194   : > { %v1416_v18 = vmax.f32 %v1305_v12, 0.0  ;;  %v1298_v12 = vadd.f32 %v5071_v31, %v5075_v35  ;;  %2827 = vmatpush.bf16.msra.mxu1 %v4419_v9  ;;  %v1411_v35 = vmax.f32 %v1293_v10, 0.0  ;;  %v4443_v9 = vld [vmem:[%s5575_s3 + $0x1b0] sm:$0xff]  ;;  %v4453_v10 = vld [vmem:[%s5575_s3 + $0x200] sm:$0xff] }
 0x195   : > { %1649 = vrot.lane.b32.xlu2 %v1456_v0, %s4588_s18  ;;  %2856 = vmatpush.bf16.msra.mxu3 %v4434_v5  ;;  %v1810_v19 = vpop.permute.xlu2 %1809 }
 0x196   : > { %v1162_v4 = vpop.f32.mrf.mxu0  ;;  %v1514_v23 = vpack.c.bf16 %v1416_v18, %v1416_v18 }
 0x197   : > { %v1163_v6 = vadd.f32 %v5071_v31, %v1162_v4  ;;  %v1410_v4 = vmax.f32 %v1290_v57, 0.0 }
 0x198   : > { %1880 = vst.msk [vmem:[#allocation2 + $0x60] sm:$0xf] %vm1523_vm1, %v1514_v23 }
 0x199   : > { %v1359_v8 = vmax.f32 %v1163_v6, 0.0  ;;  %2857 = vmatpush.bf16.msra.mxu3 %v4433_v16  ;;  %v5128_v29 = vpop.f32.mrf.mxu3  ;;  %v1504_v6 = vpack.c.bf16 %v1406_v62, %v1406_v62  ;;  %v1275_v16 = vadd.f32 %v5071_v31, %v4958_v43  ;;  %v4418_v43 = vld [vmem:[%s5575_s3 + $0xe8] sm:$0xff]  ;;  %v4455_v62 = vld [vmem:[%s5575_s3 + $0x210] sm:$0xff] }
 0x19a   : > { %2828 = vmatpush.bf16.msra.mxu1 %v4418_v43  ;;  %v1308_v3 = vadd.f32 %v5071_v31, %v5128_v29  ;;  %v4441_v43 = vld [vmem:[%s5575_s3 + $0x1a0] sm:$0xff] }
 0x19b   : > { %v1457_v17 = vpack.c.bf16 %v1359_v8, %v1359_v8  ;;  %v1508_v8 = vpack.c.bf16 %v1410_v4, %v1410_v4  ;;  %v1404_v23 = vmax.f32 %v1275_v16, 0.0  ;;  %v4442_v16 = vld [vmem:[%s5575_s3 + $0x1a8] sm:$0xff] }
 0x19c   : > { %v1417_v29 = vmax.f32 %v1308_v3, 0.0 }
 0x19d   : > { %1655 = vst.msk [vmem:[#allocation2 + $0x10] sm:$0xf] %vm1523_vm1, %v1457_v17  ;;  %v1800_v21 = vpop.permute.xlu0 %1799  ;;  %2858 = vmatpush.bf16.msra.mxu3 %v4432_v24  ;;  %v1606_v32 = vpop.permute.xlu2 %1605  ;;  %v4417_v24 = vld [vmem:[%s5575_s3 + $0xe0] sm:$0xff] }
 0x19e   : > { %1804 = vst.msk [vmem:[#allocation2 + $0x54] sm:$0xf] %vm1545_vm3, %v1800_v21  ;;  %v1164_v22 = vpop.f32.mrf.mxu0  ;;  %v1413_v21 = vmax.f32 %v1298_v12, 0.0  ;;  %2829 = vmatpush.bf16.msra.mxu1 %v4417_v24  ;;  %v4439_v24 = vld [vmem:[%s5575_s3 + $0x190] sm:$0xff] }
 0x19f   : > { %1814 = vst.msk [vmem:[#allocation2 + $0x54] sm:$0xf] %vm1556_vm4, %v1810_v19  ;;  %v1165_v25 = vadd.f32 %v5071_v31, %v1164_v22 }
 0x1a1   : > { %v1360_v15 = vmax.f32 %v1165_v25, 0.0  ;;  %2859 = vmatpush.bf16.msra.mxu3 %v4431_v26  ;;  %v1309_v41 = vpop.f32.mrf.mxu3  ;;  %v4459_v25 = vld [vmem:[%s5575_s3 + $0x230] sm:$0xff]  ;;  %v1511_v26 = vpack.c.bf16 %v1413_v21, %v1413_v21  ;;  %v4440_v21 = vld [vmem:[%s5575_s3 + $0x198] sm:$0xff] }
 0x1a3   : > { %v1458_v28 = vpack.c.bf16 %v1360_v15, %v1360_v15  ;;  %v1509_v15 = vpack.c.bf16 %v1411_v35, %v1411_v35 }
 0x1a5   : > { %1656 = vst.msk [vmem:[#allocation2 + $0x44] sm:$0xf] %vm1523_vm1, %v1458_v28  ;;  %v1808_v27 = vpop.permute.xlu1 %1807  ;;  %v1596_v1 = vpop.permute.xlu0 %1595  ;;  %2860 = vmatpush.bf16.msra.mxu3 %v4430_v30  ;;  %v1300_v28 = vadd.f32 %v5071_v31, %v5087_v49  ;;  %v4458_v49 = vld [vmem:[%s5575_s3 + $0x228] sm:$0xff] }
 0x1a6   : > { %1813 = vst.msk [vmem:[#allocation2 + $0x20] sm:$0xf] %vm1556_vm4, %v1808_v27  ;;  %v1167_v63 = vpop.f32.mrf.mxu0  ;;  %v1502_v27 = vpack.c.bf16 %v1404_v23, %v1404_v23  ;;  %v4427_v23 = vld [vmem:[%s5575_s3 + $0x130] sm:$0xff] }
 0x1a7   : > { %1601 = vst.msk [vmem:[#allocation2 + $0x8] sm:$0xf] %vm1534_vm2, %v1596_v1  ;;  %v1168_v34 = vadd.f32 %v5071_v31, %v1167_v63  ;;  %v1288_v1 = vadd.f32 %v5071_v31, %v5019_v59  ;;  %v4416_v59 = vld [vmem:[%s5575_s3 + $0xd8] sm:$0xff] }
 0x1a8   : > { %1611 = vst.msk [vmem:[#allocation2 + $0x8] sm:$0xf] %vm1545_vm3, %v1606_v32  ;;  %v1414_v32 = vmax.f32 %v1300_v28, 0.0  ;;  %2830 = vmatpush.bf16.msra.mxu1 %v4416_v59  ;;  %v4421_v59 = vld [vmem:[%s5575_s3 + $0x100] sm:$0xff] }
 0x1a9   : > { %v1361_v36 = vmax.f32 %v1168_v34, 0.0  ;;  %2861 = vmatpush.bf16.msra.mxu3 %v4429_v37  ;;  %v5150_v54 = vpop.f32.mrf.mxu3  ;;  %v4415_v37 = vld [vmem:[%s5575_s3 + $0xd0] sm:$0xff] }
 0x1ab   : > { %v1459_v38 = vpack.c.bf16 %v1361_v36, %v1361_v36  ;;  %v1409_v36 = vmax.f32 %v1288_v1, 0.0  ;;  %v4424_v1 = vld [vmem:[%s5575_s3 + $0x118] sm:$0xff] }
 0x1ac   : > { %2831 = vmatpush.bf16.msra.mxu1 %v4415_v37 }
 0x1ad   : > { %v1598_v39 = vpop.permute.xlu1 %1597  ;;  %1659 = vrot.lane.b32.xlu0 %v1459_v38, %s4590_s20  ;;  %v1313_v38 = vadd.f32 %v5071_v31, %v5150_v54  ;;  %v3775_v12 = vld [vmem:[#allocation2 + $0x20] sm:$0xf] }
 0x1ae   : > { %1602 = vst.msk [vmem:[#allocation2 + $0x3c] sm:$0xf] %vm1534_vm2, %v1598_v39  ;;  %v1169_v40 = vpop.f32.mrf.mxu0  ;;  %v1618_v52 = vpop.permute.xlu2 %1617 }
 0x1af   : > { %v1170_v42 = vadd.f32 %v5071_v31, %v1169_v40  ;;  %v4457_v40 = vld [vmem:[%s5575_s3 + $0x220] sm:$0xff]  ;;  %v1419_v51 = vmax.f32 %v1313_v38, 0.0  ;;  %v4468_v38 = vld [vmem:[%s5575_s3 + $0x278] sm:$0xff] }
 0x1b1   : > { %v1362_v44 = vmax.f32 %v1170_v42, 0.0  ;;  %v5166_v7 = vpop.f32.mrf.mxu3  ;;  %v1517_v56 = vpack.c.bf16 %v1419_v51, %v1419_v51  ;;  %v4465_v51 = vld [vmem:[%s5575_s3 + $0x260] sm:$0xff] }
 0x1b3   : > { %v1460_v46 = vpack.c.bf16 %v1362_v44, %v1362_v44  ;;  %v1507_v44 = vpack.c.bf16 %v1409_v36, %v1409_v36  ;;  %v4452_v36 = vld [vmem:[%s5575_s3 + $0x1f8] sm:$0xff] }
 0x1b5   : > { %1661 = vrot.lane.b32.xlu1 %v1460_v46, %s4590_s20  ;;  %v4378_v46 = vld [vmem:[#allocation2 + $0x14] sm:$0xf] }
 0x1b6   : > { %v1172_v48 = vpop.f32.mrf.mxu0  ;;  %v1608_v50 = vpop.permute.xlu0 %1607 }
 0x1b7   : > { %v1173_v53 = vadd.f32 %v5071_v31, %v1172_v48  ;;  %1612 = vst.msk [vmem:[#allocation2 + $0x3c] sm:$0xf] %vm1545_vm3, %v1608_v50  ;;  %v3761_v48 = vld [vmem:[#allocation2 + $0x44] sm:$0xf0] }
 0x1b8   : > { %1622 = vst.msk [vmem:[#allocation2 + $0x3c] sm:$0xf] %vm1556_vm4, %v1618_v52  ;;  %v4414_v50 = vld [vmem:[%s5575_s3 + $0xc8] sm:$0xff]  ;;  %v3764_v54 = vor.u32 %v4378_v46, %v3761_v48  ;;  %v3767_v46 = vld [vmem:[#allocation2 + $0x18] sm:$0xf] }
 0x1b9   : > { %v1363_v55 = vmax.f32 %v1173_v53, 0.0  ;;  %v1317_v63 = vpop.f32.mrf.mxu3  ;;  %2832 = vmatpush.bf16.msra.mxu1 %v4414_v50  ;;  %v4448_v48 = vld [vmem:[%s5575_s3 + $0x1d8] sm:$0xff] }
 0x1ba   : > { %v1318_v39 = vadd.f32 %v5071_v31, %v1317_v63  ;;  %v4423_v63 = vld [vmem:[%s5575_s3 + $0x110] sm:$0xff] }
 0x1bb   : > { %v1461_v58 = vpack.c.bf16 %v1363_v55, %v1363_v55  ;;  %v1412_v55 = vmax.f32 %v1295_v45, 0.0  ;;  %v4385_v45 = vld [vmem:[#allocation2 + $0x48] sm:$0xf0] }
 0x1bc   : > { %v1421_v52 = vmax.f32 %v1318_v39, 0.0  ;;  %v4451_v39 = vld [vmem:[%s5575_s3 + $0x1f0] sm:$0xff]  ;;  %v3768_v50 = vor.u32 %v4385_v45, %v3767_v46  ;;  %v4470_v46 = vld [vmem:[%s5575_s3 + $0x288] sm:$0xff] }
 0x1bd   : > { %1669 = vrot.lane.b32.xlu2 %v1461_v58, %s4589_s19  ;;  %1839 = vrot.lane.b32.xlu1 %v1503_v60, %s4588_s18  ;;  %v4413_v58 = vld [vmem:[%s5575_s3 + $0xc0] sm:$0xff] }
 0x1be   : > { %v1174_v0 = vpop.f32.mrf.mxu0  ;;  %v1616_v2 = vpop.permute.xlu1 %1615  ;;  %v1519_v60 = vpack.c.bf16 %v1421_v52, %v1421_v52  ;;  %2833 = vmatpush.bf16.msra.mxu1 %v4413_v58  ;;  %v4447_v52 = vld [vmem:[%s5575_s3 + $0x1d0] sm:$0xff] }
 0x1bf   : > { %v1175_v5 = vadd.f32 %v5071_v31, %v1174_v0  ;;  %1621 = vst.msk [vmem:[#allocation2 + $0x8] sm:$0xf] %vm1556_vm4, %v1616_v2  ;;  %v4383_v18 = vld [vmem:[#allocation2 + $0x38] sm:$0xf0]  ;;  %v1510_v2 = vpack.c.bf16 %v1412_v55, %v1412_v55 }
 0x1c0   : > { %v4444_v0 = vld [vmem:[%s5575_s3 + $0x1b8] sm:$0xff] }
 0x1c1   : > { %v1364_v11 = vmax.f32 %v1175_v5, 0.0  ;;  %v1319_v53 = vpop.f32.mrf.mxu3  ;;  %v4454_v5 = vld [vmem:[%s5575_s3 + $0x208] sm:$0xff] }
 0x1c2   : > { %v1320_v57 = vadd.f32 %v5071_v31, %v1319_v53  ;;  %2868 = vmatpush.bf16.msrb.mxu1 %v4444_v0  ;;  %v4462_v0 = vld [vmem:[%s5575_s3 + $0x248] sm:$0xff] }
 0x1c3   : > { %v1462_v13 = vpack.c.bf16 %v1364_v11, %v1364_v11 }
 0x1c4   : > { %v1422_v4 = vmax.f32 %v1320_v57, 0.0 }
 0x1c5   : > { %1841 = vrot.lane.b32.xlu2 %v1504_v6, %s4588_s18  ;;  %1853 = vrot.lane.b32.xlu1 %v1508_v8, %s4590_s20  ;;  %v1820_v17 = vpop.permute.xlu0 %1819 }
 0x1c6   : > { %1671 = vrot.lane.b32.xlu0 %v1462_v13, %s4589_s19  ;;  %1825 = vst.msk [vmem:[#allocation2 + $0x24] sm:$0xf] %vm1534_vm2, %v1820_v17  ;;  %v3751_v19 = vld [vmem:[#allocation2 + $0x8] sm:$0xf]  ;;  %v1520_v8 = vpack.c.bf16 %v1422_v4, %v1422_v4  ;;  %v4386_v13 = vld [vmem:[#allocation2 + $0x50] sm:$0xf0]  ;;  %2869 = vmatpush.bf16.msrb.mxu1 %v4443_v9  ;;  %v1515_v17 = vpack.c.bf16 %v1417_v29, %v1417_v29 }
 0x1c7   : > { %1835 = vst.msk [vmem:[#allocation2 + $0x24] sm:$0xf] %vm1545_vm3, %v4887_v33  ;;  %v3752_v22 = vor.u32 %v4383_v18, %v3751_v19  ;;  %v1310_v33 = vadd.f32 %v5071_v31, %v1309_v41  ;;  %v1512_v41 = vpack.c.bf16 %v1414_v32, %v1414_v32  ;;  %v1315_v18 = vadd.f32 %v5071_v31, %v5166_v7  ;;  %v4428_v7 = vld [vmem:[%s5575_s3 + $0x138] sm:$0xff] }
 0x1c8   : > { %v3776_v19 = vor.u32 %v4386_v13, %v3775_v12  ;;  %2840 = vmatpush.bf16.msra.mxu2 %v4428_v7  ;;  %v4484_v9 = vld [vmem:[%s5575_s3 + $0x2f8] sm:$0xff]  ;;  %v4481_v13 = vld [vmem:[%s5575_s3 + $0x2e0] sm:$0xff] }
 0x1c9   : > { %2820 = vmatmul.bf16.vlgmr.msrb.gmra.mxu3 %v3752_v22  ;;  %v1418_v34 = vmax.f32 %v1310_v33, 0.0  ;;  %v1420_v35 = vmax.f32 %v1315_v18, 0.0  ;;  %v4437_v33 = vld [vmem:[%s5575_s3 + $0x180] sm:$0xff]  ;;  %v4486_v18 = vld [vmem:[%s5575_s3 + $0x308] sm:$0xff] }
 0x1ca   : > { %2896 = vmatpush.bf16.msrb.mxu3 %v4460_v20  ;;  %2870 = vmatpush.bf16.msrb.mxu1 %v4442_v16 }
 0x1cb   : > { %v1516_v42 = vpack.c.bf16 %v1418_v34, %v1418_v34  ;;  %v1518_v22 = vpack.c.bf16 %v1420_v35, %v1420_v35  ;;  %v4485_v35 = vld [vmem:[%s5575_s3 + $0x300] sm:$0xff] }
 0x1cc   : > { %2841 = vmatpush.bf16.msra.mxu2 %v4427_v23  ;;  %v4478_v23 = vld [vmem:[%s5575_s3 + $0x2c8] sm:$0xff] }
 0x1cd   : > { %1861 = vrot.lane.b32.xlu2 %v1509_v15, %s4589_s19  ;;  %1871 = vrot.lane.b32.xlu1 %v1511_v26, %s4588_s18  ;;  %v1822_v30 = vpop.permute.xlu1 %1821  ;;  %v4438_v15 = vld [vmem:[%s5575_s3 + $0x188] sm:$0xff]  ;;  %v4425_v26 = vld [vmem:[%s5575_s3 + $0x120] sm:$0xff] }
 0x1ce   : > { %1831 = vrot.lane.b32.xlu0 %v1502_v27, %s4589_s19  ;;  %2897 = vmatpush.bf16.msrb.mxu3 %v4459_v25  ;;  %1826 = vst.msk [vmem:[#allocation2 + $0x58] sm:$0xf] %vm1534_vm2, %v1822_v30  ;;  %v4426_v25 = vld [vmem:[%s5575_s3 + $0x128] sm:$0xff] }
 0x1cf   : > { %2871 = vmatpush.bf16.msrb.mxu1 %v4441_v43  ;;  %v4476_v43 = vld [vmem:[%s5575_s3 + $0x2b8] sm:$0xff] }
 0x1d0   : > { %2842 = vmatpush.bf16.msra.mxu2 %v4426_v25  ;;  %v4475_v25 = vld [vmem:[%s5575_s3 + $0x2b0] sm:$0xff] }
 0x1d2   : > { %2898 = vmatpush.bf16.msrb.mxu3 %v4458_v49  ;;  %v4422_v49 = vld [vmem:[%s5575_s3 + $0x108] sm:$0xff] }
 0x1d3   : > { %2872 = vmatpush.bf16.msrb.mxu1 %v4440_v21 }
 0x1d4   : > { %2843 = vmatpush.bf16.msra.mxu2 %v4425_v26 }
 0x1d5   : > { %1873 = vrot.lane.b32.xlu2 %v1512_v41, %s4588_s18  ;;  %1885 = vrot.lane.b32.xlu1 %v1516_v42, %s4590_s20  ;;  %v4467_v41 = vld [vmem:[%s5575_s3 + $0x270] sm:$0xff]  ;;  %v4449_v42 = vld [vmem:[%s5575_s3 + $0x1e0] sm:$0xff] }
 0x1d6   : > { %1851 = vrot.lane.b32.xlu0 %v1507_v44, %s4590_s20  ;;  %2899 = vmatpush.bf16.msrb.mxu3 %v4457_v40  ;;  %v4450_v40 = vld [vmem:[%s5575_s3 + $0x1e8] sm:$0xff] }
 0x1d7   : > { %v1638_v6 = vpop.permute.xlu2 %1637  ;;  %2873 = vmatpush.bf16.msrb.mxu1 %v4439_v24  ;;  %v4466_v44 = vld [vmem:[%s5575_s3 + $0x268] sm:$0xff] }
 0x1d8   : > { %2844 = vmatpush.bf16.msra.mxu2 %v4424_v1 }
 0x1d9   : > { %2862 = vmatmul.bf16.vlgmr.msra.gmra.mxu3 %v3764_v54  ;;  %v4446_v54 = vld [vmem:[%s5575_s3 + $0x1c8] sm:$0xff] }
 0x1da   : > { %2900 = vmatpush.bf16.msrb.mxu3 %v4456_v14  ;;  %v4464_v14 = vld [vmem:[%s5575_s3 + $0x258] sm:$0xff] }
 0x1db   : > { %2874 = vmatpush.bf16.msrb.mxu1 %v4438_v15  ;;  %v4477_v15 = vld [vmem:[%s5575_s3 + $0x2c0] sm:$0xff] }
 0x1dc   : > { %2845 = vmatpush.bf16.msra.mxu2 %v4423_v63 }
 0x1dd   : > { %1893 = vrot.lane.b32.xlu2 %v1517_v56, %s4589_s19  ;;  %1903 = vrot.lane.b32.xlu1 %v1519_v60, %s4588_s18  ;;  %v4463_v60 = vld [vmem:[%s5575_s3 + $0x250] sm:$0xff] }
 0x1de   : > { %1863 = vrot.lane.b32.xlu0 %v1510_v2, %s4589_s19  ;;  %2901 = vmatpush.bf16.msrb.mxu3 %v4455_v62  ;;  %v4445_v62 = vld [vmem:[%s5575_s3 + $0x1c0] sm:$0xff] }
 0x1df   : > { %v1628_v11 = vpop.permute.xlu0 %1627  ;;  %2875 = vmatpush.bf16.msrb.mxu1 %v4437_v33  ;;  %v4474_v33 = vld [vmem:[%s5575_s3 + $0x2a8] sm:$0xff] }
 0x1e0   : > { %1633 = vst.msk [vmem:[#allocation2 + $0xc] sm:$0xf] %vm1534_vm2, %v1628_v11  ;;  %2846 = vmatpush.bf16.msra.mxu2 %v4422_v49 }
 0x1e1   : > { %1643 = vst.msk [vmem:[#allocation2 + $0xc] sm:$0xf] %vm1545_vm3, %v1638_v6 }
 0x1e2   : > { %2902 = vmatpush.bf16.msrb.mxu3 %v4454_v5 }
 0x1e4   : > { %2847 = vmatpush.bf16.msra.mxu2 %v4421_v59  ;;  %v4379_v59 = vld [vmem:[#allocation2 + $0x1c] sm:$0xf] }
 0x1e5   : > { %1905 = vrot.lane.b32.xlu2 %v1520_v8, %s4588_s18  ;;  %v4483_v8 = vld [vmem:[%s5575_s3 + $0x2f0] sm:$0xff] }
 0x1e6   : > { %1883 = vrot.lane.b32.xlu0 %v1515_v17, %s4590_s20  ;;  %2903 = vmatpush.bf16.msrb.mxu3 %v4453_v10  ;;  %v4480_v17 = vld [vmem:[%s5575_s3 + $0x2d8] sm:$0xff]  ;;  %s4322_s20 = sshll.u32 %s4695_s21, 4 }
 0x1e7   : > { %v1630_v20 = vpop.permute.xlu1 %1629  ;;  %s5439_s17 = scalar_lea.vmem %s5585_s13, %s4322_s20  ;;  %s551_s27 = scalar_lea.vmem %s5586_s14, %s4322_s20 }
 0x1e8   : > { %1634 = vst.msk [vmem:[#allocation2 + $0x40] sm:$0xf] %vm1534_vm2, %v1630_v20  ;;  %2882 = vmatpush.bf16.msrb.mxu2 %v4452_v36  ;;  %v4472_v36 = vld [vmem:[%s5575_s3 + $0x298] sm:$0xff] }
 0x1e9   : > { %2904 = vmatmul.bf16.vlgmr.msrb.gmra.mxu3 %v3776_v19 }
 0x1ea   : > { %2938 = vmatpush.bf16.msra.mxu3 %v4484_v9  ;;  %v4559_v9 = vld [vmem:[%s5576_s4] ss:$0 sm:$0xff] }
 0x1ec   : > { %2883 = vmatpush.bf16.msrb.mxu2 %v4451_v39 }
 0x1ee   : > { %1895 = vrot.lane.b32.xlu0 %v1518_v22, %s4589_s19  ;;  %2939 = vmatpush.bf16.msra.mxu3 %v4483_v8 }
 0x1ef   : > { %v1650_v27 = vpop.permute.xlu2 %1649 }
 0x1f0   : > { %2884 = vmatpush.bf16.msrb.mxu2 %v4450_v40 }
 0x1f2   : > { %v1322_v56 = vpop.f32.mrf.mxu3 }
 0x1f3   : > { %v1323_v57 = vadd.f32 %v5071_v31, %v1322_v56 }
 0x1f4   : > { %2885 = vmatpush.bf16.msrb.mxu2 %v4449_v42 }
 0x1f5   : > { %v1423_v58 = vmax.f32 %v1323_v57, 0.0 }
 0x1f7   : > { %v1640_v28 = vpop.permute.xlu0 %1639  ;;  %v1521_v2 = vpack.c.bf16 %v1423_v58, %v1423_v58 }
 0x1f8   : > { %1644 = vst.msk [vmem:[#allocation2 + $0x40] sm:$0xf] %vm1545_vm3, %v1640_v28  ;;  %2886 = vmatpush.bf16.msrb.mxu2 %v4448_v48  ;;  %v4469_v48 = vld [vmem:[%s5575_s3 + $0x280] sm:$0xff] }
 0x1f9   : > { %1654 = vst.msk [vmem:[#allocation2 + $0x40] sm:$0xf] %vm1556_vm4, %v1650_v27 }
 0x1fa   : > { %1911 = vst.msk [vmem:[#allocation2 + $0x30] sm:$0xf] %vm1523_vm1, %v1521_v2  ;;  %v1324_v4 = vpop.f32.mrf.mxu3 }
 0x1fb   : > { %v1325_v5 = vadd.f32 %v5071_v31, %v1324_v4  ;;  %v4482_v31 = vld [vmem:[%s5575_s3 + $0x2e8] sm:$0xff] }
 0x1fc   : > { %2887 = vmatpush.bf16.msrb.mxu2 %v4447_v52  ;;  %2940 = vmatpush.bf16.msra.mxu3 %v4482_v31 }
 0x1fd   : > { %v1424_v11 = vmax.f32 %v1325_v5, 0.0 }
 0x1ff   : > { %v1648_v30 = vpop.permute.xlu1 %1647  ;;  %v1522_v29 = vpack.c.bf16 %v1424_v11, %v1424_v11 }
 0x200   : > { %1653 = vst.msk [vmem:[#allocation2 + $0xc] sm:$0xf] %vm1556_vm4, %v1648_v30  ;;  %v3753_v34 = vld [vmem:[#allocation2 + $0x3c] sm:$0xf0]  ;;  %2888 = vmatpush.bf16.msrb.mxu2 %v4446_v54  ;;  %2941 = vmatpush.bf16.msra.mxu3 %v4481_v13 }
 0x201   : > { %1912 = vst.msk [vmem:[#allocation2 + $0x64] sm:$0xf] %vm1523_vm1, %v1522_v29  ;;  %v4473_v30 = vld [vmem:[%s5575_s3 + $0x2a0] sm:$0xff]  ;;  %v3791_v39 = vld [vmem:[#allocation2 + $0x30] sm:$0xf] }
 0x204   : > { %2889 = vmatpush.bf16.msrb.mxu2 %v4445_v62  ;;  %2942 = vmatpush.bf16.msra.mxu3 %v4480_v17 }
 0x207   : > { %v4377_v32 = vld [vmem:[#allocation2 + $0xc] sm:$0xf] }
 0x208   : > { %v3756_v37 = vor.u32 %v4377_v32, %v3753_v34  ;;  %v3769_v32 = vld [vmem:[#allocation2 + $0x4c] sm:$0xf0]  ;;  %v4388_v40 = vld [vmem:[#allocation2 + $0x60] sm:$0xf0] }
 0x20a   : > { %2834 = vmatmul.bf16.vlgmr.msra.gmra.mxu1 %v3756_v37  ;;  %v3772_v37 = vor.u32 %v4379_v59, %v3769_v32 }
 0x20b   : > { %2910 = vmatpush.bf16.msra.mxu1 %v4468_v38  ;;  %v4471_v38 = vld [vmem:[%s5575_s3 + $0x290] sm:$0xff] }
 0x20c   : > { %v2807_v58 = vpop.f32.mrf.mxu2 }
 0x20f   : > { %2911 = vmatpush.bf16.msra.mxu1 %v4467_v41 }
 0x213   : > { %2912 = vmatpush.bf16.msra.mxu1 %v4466_v44  ;;  %v3792_v44 = vor.u32 %v4388_v40, %v3791_v39 }
 0x214   : > { %v2809_v2 = vpop.f32.mrf.mxu2 }
 0x217   : > { %2913 = vmatpush.bf16.msra.mxu1 %v4465_v51  ;;  %v1670_v55 = vpop.permute.xlu2 %1669 }
 0x21a   : > { %2876 = vmatmul.bf16.vlgmr.msrb.gmra.mxu1 %v3768_v50 }
 0x21b   : > { %2914 = vmatpush.bf16.msra.mxu1 %v4464_v14 }
 0x21f   : > { %v1660_v53 = vpop.permute.xlu0 %1659  ;;  %2915 = vmatpush.bf16.msra.mxu1 %v4463_v60  ;;  %v1842_v16 = vpop.permute.xlu2 %1841 }
 0x220   : > { %1665 = vst.msk [vmem:[#allocation2 + $0x10] sm:$0xf] %vm1534_vm2, %v1660_v53  ;;  %v2793_v60 = vpop.f32.mrf.mxu1 }
 0x221   : > { %1675 = vst.msk [vmem:[#allocation2 + $0x10] sm:$0xf] %vm1545_vm3, %v1670_v55 }
 0x222   : > { %1685 = vst.msk [vmem:[#allocation2 + $0x10] sm:$0xf] %vm1556_vm4, %v4919_v61  ;;  %v4461_v61 = vld [vmem:[%s5575_s3 + $0x240] sm:$0xff] }
 0x223   : > { %2916 = vmatpush.bf16.msra.mxu1 %v4462_v0 }
 0x227   : > { %v1662_v3 = vpop.permute.xlu1 %1661  ;;  %2917 = vmatpush.bf16.msra.mxu1 %v4461_v61  ;;  %v1862_v24 = vpop.permute.xlu2 %1861 }
 0x228   : > { %1666 = vst.msk [vmem:[#allocation2 + $0x44] sm:$0xf] %vm1534_vm2, %v1662_v3  ;;  %v2795_v57 = vpop.f32.mrf.mxu1 }
 0x229   : > { %v3759_v7 = vld [vmem:[#allocation2 + $0x10] sm:$0xf]  ;;  %v2796_v17 = vadd.f32 %v4559_v9, %v2795_v57 }
 0x22b   : > { %2958 = vmatpush.bf16.msrb.mxu1 %v4486_v18 }
 0x22f   : > { %v1840_v6 = vpop.permute.xlu1 %1839  ;;  %2959 = vmatpush.bf16.msrb.mxu1 %v4485_v35  ;;  %v1874_v49 = vpop.permute.xlu2 %1873 }
 0x230   : > { %1845 = vst.msk [vmem:[#allocation2 + $0x24] sm:$0xf] %vm1556_vm4, %v1840_v6  ;;  %v2794_v6 = vadd.f32 %v4559_v9, %v2793_v60 }
 0x232   : > { %v2808_v31 = vadd.f32 %v2807_v58, %v2794_v6 }
 0x237   : > { %v1854_v10 = vpop.permute.xlu1 %1853  ;;  %v4380_v27 = vld [vmem:[#allocation2 + $0x24] sm:$0xf]  ;;  %v1894_v45 = vpop.permute.xlu2 %1893 }
 0x238   : > { %1858 = vst.msk [vmem:[#allocation2 + $0x5c] sm:$0xf] %vm1534_vm2, %v1854_v10  ;;  %v1672_v12 = vpop.permute.xlu0 %1671 }
 0x239   : > { %1676 = vst.msk [vmem:[#allocation2 + $0x44] sm:$0xf] %vm1545_vm3, %v1672_v12 }
 0x23a   : > { %1686 = vst.msk [vmem:[#allocation2 + $0x44] sm:$0xf] %vm1556_vm4, %v4901_v47  ;;  %v4479_v47 = vld [vmem:[%s5575_s3 + $0x2d0] sm:$0xff] }
 0x23b   : > { %2943 = vmatpush.bf16.msra.mxu3 %v4479_v47 }
 0x23f   : > { %v1872_v19 = vpop.permute.xlu1 %1871  ;;  %2944 = vmatpush.bf16.msra.mxu3 %v4478_v23  ;;  %v1906_v52 = vpop.permute.xlu2 %1905 }
 0x240   : > { %v1832_v20 = vpop.permute.xlu0 %1831 }
 0x241   : > { %1836 = vst.msk [vmem:[#allocation2 + $0x58] sm:$0xf] %vm1545_vm3, %v1832_v20  ;;  %v4384_v21 = vld [vmem:[#allocation2 + $0x40] sm:$0xf0] }
 0x242   : > { %1846 = vst.msk [vmem:[#allocation2 + $0x58] sm:$0xf] %vm1556_vm4, %v1842_v16  ;;  %v3760_v22 = vor.u32 %v4384_v21, %v3759_v7 }
 0x243   : > { %2945 = vmatpush.bf16.msra.mxu3 %v4477_v15 }
 0x244   : > { %2848 = vmatmul.bf16.vlgmr.msra.gmra.mxu2 %v3760_v22 }
 0x245   : > { %2924 = vmatpush.bf16.msra.mxu2 %v4476_v43 }
 0x247   : > { %v1886_v26 = vpop.permute.xlu1 %1885 }
 0x248   : > { %1890 = vst.msk [vmem:[#allocation2 + $0x60] sm:$0xf] %vm1534_vm2, %v1886_v26  ;;  %v1852_v28 = vpop.permute.xlu0 %1851 }
 0x249   : > { %1857 = vst.msk [vmem:[#allocation2 + $0x28] sm:$0xf] %vm1534_vm2, %v1852_v28  ;;  %2925 = vmatpush.bf16.msra.mxu2 %v4475_v25  ;;  %v3777_v1 = vld [vmem:[#allocation2 + $0x54] sm:$0xf0] }
 0x24a   : > { %1867 = vst.msk [vmem:[#allocation2 + $0x28] sm:$0xf] %vm1545_vm3, %v1862_v24  ;;  %v3780_v63 = vor.u32 %v4380_v27, %v3777_v1 }
 0x24b   : > { %1877 = vst.msk [vmem:[#allocation2 + $0x28] sm:$0xf] %vm1556_vm4, %v1872_v19  ;;  %v2810_v19 = vadd.f32 %v2809_v2, %v2796_v17 }
 0x24c   : > { %2918 = vmatmul.bf16.vlgmr.msra.gmra.mxu1 %v3780_v63  ;;  %v2821_v62 = vpop.f32.mrf.mxu3 }
 0x24d   : > { %2926 = vmatpush.bf16.msra.mxu2 %v4474_v33  ;;  %v2822_v12 = vadd.f32 %v2821_v62, %v2808_v31 }
 0x24f   : > { %v1904_v42 = vpop.permute.xlu1 %1903 }
 0x250   : > { %v1864_v34 = vpop.permute.xlu0 %1863 }
 0x251   : > { %1868 = vst.msk [vmem:[#allocation2 + $0x5c] sm:$0xf] %vm1545_vm3, %v1864_v34  ;;  %2927 = vmatpush.bf16.msra.mxu2 %v4473_v30 }
 0x252   : > { %1878 = vst.msk [vmem:[#allocation2 + $0x5c] sm:$0xf] %vm1556_vm4, %v1874_v49  ;;  %v3783_v14 = vld [vmem:[#allocation2 + $0x28] sm:$0xf] }
 0x254   : > { %2890 = vmatmul.bf16.vlgmr.msrb.gmra.mxu2 %v3772_v37  ;;  %v2823_v3 = vpop.f32.mrf.mxu3 }
 0x255   : > { %2928 = vmatpush.bf16.msra.mxu2 %v4472_v36  ;;  %v2824_v47 = vadd.f32 %v2823_v3, %v2810_v19 }
 0x258   : > { %v1884_v41 = vpop.permute.xlu0 %1883 }
 0x259   : > { %1889 = vst.msk [vmem:[#allocation2 + $0x2c] sm:$0xf] %vm1534_vm2, %v1884_v41  ;;  %2929 = vmatpush.bf16.msra.mxu2 %v4471_v38  ;;  %v4387_v50 = vld [vmem:[#allocation2 + $0x58] sm:$0xf0] }
 0x25a   : > { %1899 = vst.msk [vmem:[#allocation2 + $0x2c] sm:$0xf] %vm1545_vm3, %v1894_v45  ;;  %v3784_v53 = vor.u32 %v4387_v50, %v3783_v14 }
 0x25b   : > { %1909 = vst.msk [vmem:[#allocation2 + $0x2c] sm:$0xf] %vm1556_vm4, %v1904_v42 }
 0x25c   : > { %4185 = vmatmul.msk.bf16.vlgmr.msrb.gmra.mxu1 %vm2780_vm5, %v3792_v44  ;;  %v2863_v5 = vpop.f32.mrf.mxu3 }
 0x25d   : > { %2930 = vmatpush.bf16.msra.mxu2 %v4470_v46 }
 0x260   : > { %v1896_v51 = vpop.permute.xlu0 %1895 }
 0x261   : > { %1900 = vst.msk [vmem:[#allocation2 + $0x60] sm:$0xf] %vm1545_vm3, %v1896_v51  ;;  %2931 = vmatpush.bf16.msra.mxu2 %v4469_v48 }
 0x262   : > { %1910 = vst.msk [vmem:[#allocation2 + $0x60] sm:$0xf] %vm1556_vm4, %v1906_v52  ;;  %v4381_v54 = vld [vmem:[#allocation2 + $0x2c] sm:$0xf] }
 0x264   : > { %2932 = vmatmul.bf16.vlgmr.msra.gmra.mxu2 %v3784_v53  ;;  %v2865_v8 = vpop.f32.mrf.mxu3 }
 0x269   : > { %v3785_v55 = vld [vmem:[#allocation2 + $0x5c] sm:$0xf0] }
 0x26a   : > { %v3788_v56 = vor.u32 %v4381_v54, %v3785_v55 }
 0x26c   : > { %2946 = vmatmul.bf16.vlgmr.msra.gmra.mxu3 %v3788_v56  ;;  %v2905_v20 = vpop.f32.mrf.mxu3 }
 0x274   : > { %v2907_v15 = vpop.f32.mrf.mxu3 }
 0x287   : > { %v2835_v0 = vpop.f32.mrf.mxu1 }
 0x288   : > { %v2836_v16 = vadd.f32 %v2835_v0, %v2822_v12 }
 0x28f   : > { %v2837_v4 = vpop.f32.mrf.mxu1 }
 0x290   : > { %v2838_v21 = vadd.f32 %v2837_v4, %v2824_v47 }
 0x297   : > { %v2877_v11 = vpop.f32.mrf.mxu1 }
 0x29f   : > { %v2879_v10 = vpop.f32.mrf.mxu1 }
 0x2c7   : > { %v2849_v61 = vpop.f32.mrf.mxu2 }
 0x2c8   : > { %v2850_v18 = vadd.f32 %v2849_v61, %v2836_v16 }
 0x2c9   : > { %v2919_v43 = vpop.f32.mrf.mxu1 }
 0x2ca   : > { %v2864_v35 = vadd.f32 %v2863_v5, %v2850_v18 }
 0x2cc   : > { %v2878_v23 = vadd.f32 %v2877_v11, %v2864_v35 }
 0x2cf   : > { %v2851_v29 = vpop.f32.mrf.mxu2 }
 0x2d0   : > { %v2852_v22 = vadd.f32 %v2851_v29, %v2838_v21 }
 0x2d1   : > { %v2921_v26 = vpop.f32.mrf.mxu1 }
 0x2d2   : > { %v2866_v25 = vadd.f32 %v2865_v8, %v2852_v22 }
 0x2d4   : > { %v2880_v27 = vadd.f32 %v2879_v10, %v2866_v25 }
 0x2d7   : > { %v2891_v13 = vpop.f32.mrf.mxu2 }
 0x2d8   : > { %v2892_v24 = vadd.f32 %v2891_v13, %v2878_v23 }
 0x2d9   : > { %v2961_v49 = vpop.f32.mrf.mxu1 }
 0x2da   : > { %v2906_v28 = vadd.f32 %v2905_v20, %v2892_v24 }
 0x2dc   : > { %v2920_v63 = vadd.f32 %v2919_v43, %v2906_v28 }
 0x2df   : > { %v2893_v7 = vpop.f32.mrf.mxu2 }
 0x2e0   : > { %v2894_v1 = vadd.f32 %v2893_v7, %v2880_v27 }
 0x2e1   : > { %v2963_v42 = vpop.f32.mrf.mxu1 }
 0x2e2   : > { %v2908_v32 = vadd.f32 %v2907_v15, %v2894_v1 }
 0x2e4   : > { %v2922_v38 = vadd.f32 %v2921_v26, %v2908_v32 }
 0x2e7   : > { %v2933_v33 = vpop.f32.mrf.mxu2 }
 0x2e8   : > { %v2934_v30 = vadd.f32 %v2933_v33, %v2920_v63 }
 0x2ef   : > { %v2947_v59 = vpop.f32.mrf.mxu3  ;;  %v2935_v37 = vpop.f32.mrf.mxu2 }
 0x2f0   : > { %v2948_v34 = vadd.f32 %v2947_v59, %v2934_v30  ;;  %v2936_v39 = vadd.f32 %v2935_v37, %v2922_v38 }
 0x2f2   : > { %v2962_v36 = vadd.f32 %v2961_v49, %v2948_v34 }
 0x2f4   : > { %2966 = vst [vmem:[%s551_s27] sm:$0xff] %v2962_v36 }
 0x2f7   : > { %v2949_v40 = vpop.f32.mrf.mxu3 }
 0x2f8   : > { %v2950_v41 = vadd.f32 %v2949_v40, %v2936_v39  ;;  %2971 = sbr.rel (%p4186_p5) target bundleno = 1229 (0x4cd), region = 76 }
 0x2fa   : > { %v2964_v44 = vadd.f32 %v2963_v42, %v2950_v41 }
 0x2fc   : > { %2967 = vst [vmem:[%s551_s27 + $0x8] sm:$0xff] %v2964_v44 }
 0x2fd   : > { %v4503_v45 = vld [vmem:[%s5579_s7 + $0x38] sm:$0xff]  ;;  %v4502_v48 = vld [vmem:[%s5579_s7 + $0x30] sm:$0xff]  ;;  %v4501_v52 = vld [vmem:[%s5579_s7 + $0x28] sm:$0xff]  ;;  %v2972_v11 = vpack.c.bf16 %v2964_v44, %v2962_v36 }
 0x2fe   : > { %v4494_v46 = vld [vmem:[%s5578_s6 + $0x38] sm:$0xff]  ;;  %3061 = vmatpush.bf16.msra.mxu0 %v4503_v45  ;;  %v4493_v50 = vld [vmem:[%s5578_s6 + $0x30] sm:$0xff]  ;;  %v4492_v14 = vld [vmem:[%s5578_s6 + $0x28] sm:$0xff] }
 0x2ff   : > { %3123 = vmatpush.bf16.msra.mxu1 %v4494_v46  ;;  %v4511_v51 = vld [vmem:[%s5581_s9 + $0x38] sm:$0xff]  ;;  %v4510_v53 = vld [vmem:[%s5581_s9 + $0x30] sm:$0xff]  ;;  %v4500_v54 = vld [vmem:[%s5579_s7 + $0x20] sm:$0xff] }
 0x300   : > { %3214 = vmatpush.bf16.msra.mxu2 %v4511_v51  ;;  %v4491_v55 = vld [vmem:[%s5578_s6 + $0x20] sm:$0xff]  ;;  %v4509_v56 = vld [vmem:[%s5581_s9 + $0x28] sm:$0xff]  ;;  %v4499_v60 = vld [vmem:[%s5579_s7 + $0x18] sm:$0xff] }
 0x301   : > { %v4490_v57 = vld [vmem:[%s5578_s6 + $0x18] sm:$0xff]  ;;  %v4508_v58 = vld [vmem:[%s5581_s9 + $0x20] sm:$0xff]  ;;  %v4498_v62 = vld [vmem:[%s5579_s7 + $0x10] sm:$0xff] }
 0x302   : > { %3062 = vmatpush.bf16.msra.mxu0 %v4502_v48  ;;  %v4489_v0 = vld [vmem:[%s5578_s6 + $0x10] sm:$0xff]  ;;  %v4497_v2 = vld [vmem:[%s5579_s7 + $0x8] sm:$0xff]  ;;  %v4496_v4 = vld [vmem:[%s5579_s7] sm:$0xff] }
 0x303   : > { %3124 = vmatpush.bf16.msra.mxu1 %v4493_v50  ;;  %v4488_v3 = vld [vmem:[%s5578_s6 + $0x8] sm:$0xff]  ;;  %v4487_v61 = vld [vmem:[%s5578_s6] sm:$0xff]  ;;  %v4507_v9 = vld [vmem:[%s5581_s9 + $0x18] sm:$0xff] }
 0x304   : > { %3215 = vmatpush.bf16.msra.mxu2 %v4510_v53  ;;  %v4495_v5 = vld [vmem:[%s5577_s5] sm:$0xff]  ;;  %v4506_v29 = vld [vmem:[%s5581_s9 + $0x10] sm:$0xff]  ;;  %v4505_v6 = vld [vmem:[%s5581_s9 + $0x8] sm:$0xff] }
 0x305   : > { %v4504_v8 = vld [vmem:[%s5581_s9] sm:$0xff]  ;;  %v4519_v31 = vld [vmem:[%s5583_s11 + $0x38] sm:$0xff]  ;;  %v4518_v10 = vld [vmem:[%s5583_s11 + $0x30] sm:$0xff] }
 0x306   : > { %3063 = vmatpush.bf16.msra.mxu0 %v4501_v52  ;;  %3299 = vmatpush.bf16.msra.mxu3 %v4519_v31  ;;  %v4517_v12 = vld [vmem:[%s5583_s11 + $0x28] sm:$0xff]  ;;  %v4516_v13 = vld [vmem:[%s5583_s11 + $0x20] sm:$0xff]  ;;  %v4515_v24 = vld [vmem:[%s5583_s11 + $0x18] sm:$0xff] }
 0x307   : > { %3125 = vmatpush.bf16.msra.mxu1 %v4492_v14  ;;  %v4561_v19 = vld [vmem:[%s5580_s8] ss:$0 sm:$0xff]  ;;  %v4514_v25 = vld [vmem:[%s5583_s11 + $0x10] sm:$0xff]  ;;  %v4513_v15 = vld [vmem:[%s5583_s11 + $0x8] sm:$0xff] }
 0x308   : > { %3216 = vmatpush.bf16.msra.mxu2 %v4509_v56  ;;  %v4512_v26 = vld [vmem:[%s5583_s11] sm:$0xff] }
 0x309   : > { %v4562_v33 = vld [vmem:[%s5582_s10] ss:$0 sm:$0xff] }
 0x30a   : > { %3064 = vmatpush.bf16.msra.mxu0 %v4500_v54  ;;  %3300 = vmatpush.bf16.msra.mxu3 %v4518_v10  ;;  %v4563_v32 = vld [vmem:[%s5584_s12] ss:$0 sm:$0xff] }
 0x30b   : > { %3126 = vmatpush.bf16.msra.mxu1 %v4491_v55 }
 0x30c   : > { %3217 = vmatpush.bf16.msra.mxu2 %v4508_v58 }
 0x30e   : > { %3065 = vmatpush.bf16.msra.mxu0 %v4499_v60  ;;  %3301 = vmatpush.bf16.msra.mxu3 %v4517_v12 }
 0x30f   : > { %3127 = vmatpush.bf16.msra.mxu1 %v4490_v57 }
 0x310   : > { %3218 = vmatpush.bf16.msra.mxu2 %v4507_v9 }
 0x312   : > { %3066 = vmatpush.bf16.msra.mxu0 %v4498_v62  ;;  %3302 = vmatpush.bf16.msra.mxu3 %v4516_v13 }
 0x313   : > { %3128 = vmatpush.bf16.msra.mxu1 %v4489_v0 }
 0x314   : > { %3219 = vmatpush.bf16.msra.mxu2 %v4506_v29 }
 0x316   : > { %3067 = vmatpush.bf16.msra.mxu0 %v4497_v2  ;;  %3303 = vmatpush.bf16.msra.mxu3 %v4515_v24 }
 0x317   : > { %3129 = vmatpush.bf16.msra.mxu1 %v4488_v3 }
 0x318   : > { %3220 = vmatpush.bf16.msra.mxu2 %v4505_v6 }
 0x31a   : > { %3068 = vmatpush.bf16.msra.mxu0 %v4496_v4  ;;  %3304 = vmatpush.bf16.msra.mxu3 %v4514_v25 }
 0x31b   : > { %3130 = vmatpush.bf16.msra.mxu1 %v4487_v61 }
 0x31c   : > { %3221 = vmatpush.bf16.msra.mxu2 %v4504_v8 }
 0x31d   : > { %3069 = vmatmul.bf16.vlgmr.msra.gmra.mxu0 %v4495_v5 }
 0x31e   : > { %3131 = vmatmul.bf16.vlgmr.msra.gmra.mxu1 %v2972_v11  ;;  %3305 = vmatpush.bf16.msra.mxu3 %v4513_v15 }
 0x322   : > { %3306 = vmatpush.bf16.msra.mxu3 %v4512_v26 }
 0x39a   : > { %v3070_v16 = vpop.f32.mrf.mxu0 }
 0x39b   : > { %v3132_v17 = vpop.f32.mrf.mxu1 }
 0x39c   : > { %v3133_v18 = vadd.f32 %v3132_v17, %v3070_v16 }
 0x39e   : > { %v3141_v47 = vadd.f32 %v4561_v19, %v3133_v18 }
 0x3a0   : > { %v3143_v21 = vmax.f32 %v3141_v47, 0.0 }
 0x3a2   : > { %v3072_v20 = vpop.f32.mrf.mxu0 }
 0x3a3   : > { %v3134_v43 = vpop.f32.mrf.mxu1 }
 0x3a4   : > { %v3135_v35 = vadd.f32 %v3134_v43, %v3072_v20 }
 0x3a6   : > { %v3142_v7 = vadd.f32 %v4561_v19, %v3135_v35 }
 0x3a8   : > { %v3144_v22 = vmax.f32 %v3142_v7, 0.0 }
 0x3aa   : > { %v3145_v23 = vpack.c.bf16 %v3144_v22, %v3143_v21 }
 0x3ac   : > { %3222 = vmatmul.bf16.vlgmr.msra.gmra.mxu2 %v3145_v23 }
 0x42f   : > { %v3223_v28 = vpop.f32.mrf.mxu2 }
 0x430   : > { %v3224_v27 = vadd.f32 %v4562_v33, %v3223_v28 }
 0x432   : > { %v3228_v30 = vmax.f32 %v3224_v27, 0.0 }
 0x437   : > { %v3225_v1 = vpop.f32.mrf.mxu2 }
 0x438   : > { %v3226_v63 = vadd.f32 %v4562_v33, %v3225_v1 }
 0x43a   : > { %v3229_v49 = vmax.f32 %v3226_v63, 0.0 }
 0x43c   : > { %v3230_v59 = vpack.c.bf16 %v3229_v49, %v3228_v30 }
 0x43e   : > { %3307 = vmatmul.bf16.vlgmr.msra.gmra.mxu3 %v3230_v59 }
 0x4c1   : > { %v3308_v34 = vpop.f32.mrf.mxu3 }
 0x4c2   : > { %v3309_v36 = vadd.f32 %v4563_v32, %v3308_v34 }
 0x4c4   : > { %3313 = vst [vmem:[%s5439_s17] sm:$0xff] %v3309_v36 }
 0x4c9   : > { %v3310_v37 = vpop.f32.mrf.mxu3 }
 0x4ca   : > { %v3311_v38 = vadd.f32 %v4563_v32, %v3310_v37 }
 0x4cc   : > { %3314 = vst [vmem:[%s5439_s17 + $0x8] sm:$0xff] %v3311_v38 }
 0x4cd PF: > { %p4319_p6 = scmp.eq.s32.totalorder %s4578_s29, 0 }
 0x4cf   : > { %3318 = sbr.rel (%p4319_p6) target bundleno = 1239 (0x4d7), region = 80 }
 0x4d4   : > { %v4591_v39 = vmov 0.0  }
 0x4d5   : > { %3319 = vst [vmem:[%s5439_s17] sm:$0xff] %v4591_v39 }
 0x4d6   : > { %3320 = vst [vmem:[%s5439_s17 + $0x8] sm:$0xff] %v4591_v39 }
 0x4d7 PF: > { %s25_s15 = sadd.s32 1, %s4586_s15   ;;  %s5587_s29 = smov %s4582_s30 }
 0x4d8   : > { %p22_p7 = scmp.ge.s32.totalorder %s25_s15, 4   ;;  %s5588_s30 = smov %s5590_s16 }
 0x4da   :  { %24 = sbr.rel (!%p22_p7) target bundleno = 2 (0x2), region = 125 }

</bundles_post_ra>
